<compile_context>
chip_gen: v7x
topology: tpu7x:2x2x1
jax: 0.10.0
libtpu: 0.0.40
codegen_flags: <defaults>
</compile_context>

<pallas_src>
import math
import jax
import jax.numpy as jnp
from jax.experimental import pallas as pl
from jax.experimental.pallas import tpu as pltpu

_LN_EPS = 1e-12
_INV_SQRT2 = 1.0 / math.sqrt(2.0)


def _bert_lm_head_kernel(x_ref, w1_ref, b1_ref, gamma_ref, beta_ref,
                         wd_ref, bd_ref, o_ref, h_ref):
    """One (row-tile, vocab-tile) step of decoder(LayerNorm(gelu(x @ W1 + b1))).

    x_ref    : (TM, D_in)  bf16   activation row tile (re-fetched per row tile)
    w1_ref   : (D_in, H)   bf16   dense weight (VMEM resident across the grid)
    b1_ref   : (1, H)      f32    dense bias
    gamma_ref: (1, H)      f32    LayerNorm scale
    beta_ref : (1, H)      f32    LayerNorm shift
    wd_ref   : (H, TV)     bf16   decoder weight tile (embedding matrix^T)
    bd_ref   : (1, TV)     f32    decoder bias tile
    o_ref    : (TM, TV)    f32    logits tile (lane-dense)
    h_ref    : (TM, H)     bf16   VMEM scratch: transformed hidden states,
                                  computed once per row tile at vocab step 0.
    """
    @pl.when(pl.program_id(1) == 0)
    def _():
        # Dense + bias (MXU, f32 accumulation).
        h = jnp.dot(x_ref[...], w1_ref[...],
                    preferred_element_type=jnp.float32)
        h = h + b1_ref[...]
        # Exact erf gelu (matches the PyTorch module; the tanh approximation
        # would move work to the EUP but changes numerics, so it is not used).
        h = h * 0.5 * (1.0 + jax.lax.erf(h * _INV_SQRT2))
        # Two-pass LayerNorm in f32 (matches BertLayerNorm numerics).
        mu = jnp.mean(h, axis=-1, keepdims=True)
        d = h - mu
        var = jnp.mean(d * d, axis=-1, keepdims=True)
        hn = d * jax.lax.rsqrt(var + _LN_EPS)
        hn = hn * gamma_ref[...] + beta_ref[...]
        h_ref[...] = hn.astype(h_ref.dtype)

    # Decoder matmul for this vocab tile (MXU, f32 accumulation) + bias.
    logits = jnp.dot(h_ref[...], wd_ref[...],
                     preferred_element_type=jnp.float32)
    o_ref[...] = (logits + bd_ref[...]).astype(o_ref.dtype)


def bert_lm_prediction_head(x2d, w1, b1, gamma, beta, dec_w, dec_b, *,
                            tm=256, tv=512, compute_dtype=jnp.bfloat16):
    """x2d: (N, D_in).  dec_w: (V, H) embedding weights.  Returns (N, V) logits."""
    n, d_in = x2d.shape
    hidden = w1.shape[1]
    vocab = dec_w.shape[0]
    out_dtype = x2d.dtype

    # Tile sizes: rows padded to a multiple of 8 (sublane), vocab to 128 (lane).
    tm = min(tm, max(8, ((n + 7) // 8) * 8))
    tv = min(tv, max(128, ((vocab + 127) // 128) * 128))

    n_blocks = pl.cdiv(n, tm)
    n_pad = n_blocks * tm
    v_blocks = pl.cdiv(vocab, tv)
    v_pad = v_blocks * tv

    if n_pad != n:
        x2d = jnp.pad(x2d, ((0, n_pad - n), (0, 0)))

    # bf16 MXU operands; f32 for everything touched by the epilogue.
    x_c = x2d.astype(compute_dtype)
    w1_c = w1.astype(compute_dtype)
    b1_2d = b1.reshape(1, hidden).astype(jnp.float32)
    g_2d = gamma.reshape(1, hidden).astype(jnp.float32)
    bt_2d = beta.reshape(1, hidden).astype(jnp.float32)

    wd = dec_w.astype(compute_dtype).T                     # (H, V)
    bd = dec_b.reshape(1, vocab).astype(jnp.float32)       # (1, V)
    if v_pad != vocab:
        wd = jnp.pad(wd, ((0, 0), (0, v_pad - vocab)))
        bd = jnp.pad(bd, ((0, 0), (0, v_pad - vocab)))

    const = lambda i, j: (0, 0)
    out = pl.pallas_call(
        _bert_lm_head_kernel,
        out_shape=jax.ShapeDtypeStruct((n_pad, v_pad), jnp.float32),
        grid_spec=pltpu.PrefetchScalarGridSpec(
            num_scalar_prefetch=0,
            grid=(n_blocks, v_blocks),
            in_specs=[
                pl.BlockSpec((tm, d_in), lambda i, j: (i, 0)),      # x tile
                pl.BlockSpec((d_in, hidden), const),                # W1 (resident)
                pl.BlockSpec((1, hidden), const),                   # b1
                pl.BlockSpec((1, hidden), const),                   # gamma
                pl.BlockSpec((1, hidden), const),                   # beta
                pl.BlockSpec((hidden, tv), lambda i, j: (0, j)),    # W_dec tile
                pl.BlockSpec((1, tv), lambda i, j: (0, j)),         # dec bias tile
            ],
            out_specs=pl.BlockSpec((tm, tv), lambda i, j: (i, j)),
            scratch_shapes=[pltpu.VMEM((tm, hidden), compute_dtype)],
        ),
        compiler_params=pltpu.CompilerParams(
            dimension_semantics=("parallel", "arbitrary"),
        ),
    )(x_c, w1_c, b1_2d, g_2d, bt_2d, wd, bd)

    return out[:n, :vocab].astype(out_dtype)


def bert_lm_prediction_head_ref(x2d, w1, b1, gamma, beta, dec_w, dec_b, *,
                                compute_dtype=jnp.float32):
    """Pure-JAX reference (optionally matched to the kernel's bf16 MXU operands)."""
    h = jnp.dot(x2d.astype(compute_dtype), w1.astype(compute_dtype),
                preferred_element_type=jnp.float32) + b1
    h = h * 0.5 * (1.0 + jax.lax.erf(h * _INV_SQRT2))
    mu = jnp.mean(h, axis=-1, keepdims=True)
    var = jnp.mean((h - mu) ** 2, axis=-1, keepdims=True)
    hn = (h - mu) * jax.lax.rsqrt(var + _LN_EPS)
    hn = hn * gamma + beta
    logits = jnp.dot(hn.astype(compute_dtype), dec_w.astype(compute_dtype).T,
                     preferred_element_type=jnp.float32) + dec_b
    return logits


if __name__ == "__main__":
    input_size = 768      # module default: input_size == hidden_size
    hidden_size = 768     # BertPredictionHeadTransform hardcodes 768
    vocab_size = 1000     # bert_model_embedding_weights.size(0)
    batch, seq = 2, 8

    key = jax.random.PRNGKey(0)
    kx, kw1, kb1, kg, kbt, kw2, kb2 = jax.random.split(key, 7)

    x = jax.random.normal(kx, (batch, seq, input_size), jnp.float32)

    # Synthetic parameters (nn.Linear-like scales, non-trivial LN affine).
    w1 = jax.random.normal(kw1, (input_size, hidden_size), jnp.float32) / math.sqrt(input_size)
    b1 = jax.random.normal(kb1, (hidden_size,), jnp.float32) * 0.02
    gamma = 1.0 + 0.1 * jax.random.normal(kg, (hidden_size,), jnp.float32)
    beta = 0.1 * jax.random.normal(kbt, (hidden_size,), jnp.float32)
    # decoder weight = bert_model_embedding_weights (V, H); bias parameter (V,)
    emb_w = jax.random.normal(kw2, (vocab_size, hidden_size), jnp.float32) / math.sqrt(hidden_size)
    dec_b = jax.random.normal(kb2, (vocab_size,), jnp.float32) * 0.01

    x2d = x.reshape(batch * seq, input_size)
    out2d = bert_lm_prediction_head(x2d, w1, b1, gamma, beta, emb_w, dec_b)
    out = out2d.reshape(batch, seq, vocab_size)
    jax.block_until_ready(out)

    # Matched-precision reference (bf16 MXU operands, f32 epilogue): tight tol.
    ref_match = bert_lm_prediction_head_ref(
        x2d, w1, b1, gamma, beta, emb_w, dec_b,
        compute_dtype=jnp.bfloat16).reshape(batch, seq, vocab_size)
    # Full-f32 reference: loose tol (kernel uses bf16 matmul operands).
    ref_f32 = bert_lm_prediction_head_ref(
        x2d, w1, b1, gamma, beta, emb_w, dec_b,
        compute_dtype=jnp.float32).reshape(batch, seq, vocab_size)

    assert out.shape == (batch, seq, vocab_size)
    assert jnp.allclose(out, ref_match, atol=5e-3, rtol=5e-3), \
        "mismatch vs matched-precision reference"
    assert jnp.allclose(out, ref_f32, atol=1e-1, rtol=1e-1), \
        "mismatch vs f32 reference"
    print("KERNEL_OK")
</pallas_src>

<mosaic_0001>
module attributes {stable_mosaic.version = 11 : i64} {
  func.func @_bert_lm_head_kernel(%arg0: i32, %arg1: i32, %arg2: memref<16x768xbf16, #tpu.memory_space<vmem>>, %arg3: memref<768x768xbf16, #tpu.memory_space<vmem>>, %arg4: memref<1x768xf32, #tpu.memory_space<vmem>>, %arg5: memref<1x768xf32, #tpu.memory_space<vmem>>, %arg6: memref<1x768xf32, #tpu.memory_space<vmem>>, %arg7: memref<768x512xbf16, #tpu.memory_space<vmem>>, %arg8: memref<1x512xf32, #tpu.memory_space<vmem>>, %arg9: memref<16x512xf32, #tpu.memory_space<vmem>>, %arg10: memref<16x768xbf16, #tpu.memory_space<vmem>>) attributes {dimension_semantics = [#tpu.dimension_semantics<parallel>, #tpu.dimension_semantics<arbitrary>], iteration_bounds = array<i64: 1, 2>, scalar_prefetch = 0 : i64, scratch_operands = 1 : i64, tpu.core_type = #tpu.core_type<tc>, window_params = [{transform_indices = @transform_0, window_bounds = array<i64: 16, 768>}, {pipeline_mode = #tpu.pipeline_mode<synchronous>, transform_indices = @transform_1, window_bounds = array<i64: 768, 768>}, {pipeline_mode = #tpu.pipeline_mode<synchronous>, transform_indices = @transform_2, window_bounds = array<i64: 1, 768>}, {pipeline_mode = #tpu.pipeline_mode<synchronous>, transform_indices = @transform_3, window_bounds = array<i64: 1, 768>}, {pipeline_mode = #tpu.pipeline_mode<synchronous>, transform_indices = @transform_4, window_bounds = array<i64: 1, 768>}, {transform_indices = @transform_5, window_bounds = array<i64: 768, 512>}, {transform_indices = @transform_6, window_bounds = array<i64: 1, 512>}, {transform_indices = @transform_7, window_bounds = array<i64: 16, 512>}]} {
    %c0_i32 = arith.constant 0 : i32
    %0 = arith.cmpi eq, %arg1, %c0_i32 : i32
    %1 = arith.extui %0 : i1 to i32
    %c0_i32_0 = arith.constant 0 : i32
    %2 = arith.cmpi ne, %1, %c0_i32_0 : i32
    scf.if %2 {
      %c0_8 = arith.constant 0 : index
      %c0_9 = arith.constant 0 : index
      %10 = vector.load %arg2[%c0_8, %c0_9] : memref<16x768xbf16, #tpu.memory_space<vmem>>, vector<16x768xbf16>
      %c0_10 = arith.constant 0 : index
      %c0_11 = arith.constant 0 : index
      %11 = vector.load %arg3[%c0_10, %c0_11] : memref<768x768xbf16, #tpu.memory_space<vmem>>, vector<768x768xbf16>
      %cst_12 = arith.constant dense<0.000000e+00> : vector<16x768xf32>
      %12 = tpu.matmul %10, %11, %cst_12 {dimension_numbers = #tpu.dot_dimension_numbers<[1], [0], [0], [1], [0, 0, 1, 1], [], []>} : vector<16x768xbf16>, vector<768x768xbf16>, vector<16x768xf32> -> vector<16x768xf32>
      %c0_13 = arith.constant 0 : index
      %c0_14 = arith.constant 0 : index
      %13 = vector.load %arg4[%c0_13, %c0_14] : memref<1x768xf32, #tpu.memory_space<vmem>>, vector<1x768xf32>
      %14 = vector.broadcast %13 : vector<1x768xf32> to vector<16x768xf32>
      %15 = arith.addf %12, %14 : vector<16x768xf32>
      %cst_15 = arith.constant 5.000000e-01 : f32
      %16 = vector.broadcast %cst_15 : f32 to vector<16x768xf32>
      %17 = arith.mulf %15, %16 : vector<16x768xf32>
      %cst_16 = arith.constant 0.707106769 : f32
      %18 = vector.broadcast %cst_16 : f32 to vector<16x768xf32>
      %19 = arith.mulf %15, %18 : vector<16x768xf32>
      %20 = math.erf %19 : vector<16x768xf32>
      %cst_17 = arith.constant 1.000000e+00 : f32
      %21 = vector.broadcast %cst_17 : f32 to vector<16x768xf32>
      %22 = arith.addf %21, %20 : vector<16x768xf32>
      %23 = arith.mulf %17, %22 : vector<16x768xf32>
      %cst_18 = arith.constant dense<0.000000e+00> : vector<16xf32>
      %24 = vector.multi_reduction <add>, %23, %cst_18 [1] : vector<16x768xf32> to vector<16xf32>
      %25 = vector.shape_cast %24 : vector<16xf32> to vector<16x1xf32>
      %cst_19 = arith.constant 7.680000e+02 : f32
      %26 = vector.broadcast %cst_19 : f32 to vector<16x1xf32>
      %27 = arith.divf %25, %26 : vector<16x1xf32>
      %28 = vector.broadcast %27 : vector<16x1xf32> to vector<16x768xf32>
      %29 = arith.subf %23, %28 : vector<16x768xf32>
      %30 = arith.mulf %29, %29 : vector<16x768xf32>
      %cst_20 = arith.constant dense<0.000000e+00> : vector<16xf32>
      %31 = vector.multi_reduction <add>, %30, %cst_20 [1] : vector<16x768xf32> to vector<16xf32>
      %32 = vector.shape_cast %31 : vector<16xf32> to vector<16x1xf32>
      %cst_21 = arith.constant 7.680000e+02 : f32
      %33 = vector.broadcast %cst_21 : f32 to vector<16x1xf32>
      %34 = arith.divf %32, %33 : vector<16x1xf32>
      %cst_22 = arith.constant 9.99999996E-13 : f32
      %35 = vector.broadcast %cst_22 : f32 to vector<16x1xf32>
      %36 = arith.addf %34, %35 : vector<16x1xf32>
      %37 = math.rsqrt %36 : vector<16x1xf32>
      %38 = vector.broadcast %37 : vector<16x1xf32> to vector<16x768xf32>
      %39 = arith.mulf %29, %38 : vector<16x768xf32>
      %c0_23 = arith.constant 0 : index
      %c0_24 = arith.constant 0 : index
      %40 = vector.load %arg5[%c0_23, %c0_24] : memref<1x768xf32, #tpu.memory_space<vmem>>, vector<1x768xf32>
      %41 = vector.broadcast %40 : vector<1x768xf32> to vector<16x768xf32>
      %42 = arith.mulf %39, %41 : vector<16x768xf32>
      %c0_25 = arith.constant 0 : index
      %c0_26 = arith.constant 0 : index
      %43 = vector.load %arg6[%c0_25, %c0_26] : memref<1x768xf32, #tpu.memory_space<vmem>>, vector<1x768xf32>
      %44 = vector.broadcast %43 : vector<1x768xf32> to vector<16x768xf32>
      %45 = arith.addf %42, %44 : vector<16x768xf32>
      %46 = arith.truncf %45 : vector<16x768xf32> to vector<16x768xbf16>
      %c0_27 = arith.constant 0 : index
      %c0_28 = arith.constant 0 : index
      %47 = vector.load %arg10[%c0_27, %c0_28] : memref<16x768xbf16, #tpu.memory_space<vmem>>, vector<16x768xbf16>
      tpu.vector_store %arg10[%c0_27, %c0_28], %46 {strides = array<i32>} : memref<16x768xbf16, #tpu.memory_space<vmem>>, vector<16x768xbf16>,
    } else {
    }
    %c0 = arith.constant 0 : index
    %c0_1 = arith.constant 0 : index
    %3 = vector.load %arg10[%c0, %c0_1] : memref<16x768xbf16, #tpu.memory_space<vmem>>, vector<16x768xbf16>
    %c0_2 = arith.constant 0 : index
    %c0_3 = arith.constant 0 : index
    %4 = vector.load %arg7[%c0_2, %c0_3] : memref<768x512xbf16, #tpu.memory_space<vmem>>, vector<768x512xbf16>
    %cst = arith.constant dense<0.000000e+00> : vector<16x512xf32>
    %5 = tpu.matmul %3, %4, %cst {dimension_numbers = #tpu.dot_dimension_numbers<[1], [0], [0], [1], [0, 0, 1, 1], [], []>} : vector<16x768xbf16>, vector<768x512xbf16>, vector<16x512xf32> -> vector<16x512xf32>
    %c0_4 = arith.constant 0 : index
    %c0_5 = arith.constant 0 : index
    %6 = vector.load %arg8[%c0_4, %c0_5] : memref<1x512xf32, #tpu.memory_space<vmem>>, vector<1x512xf32>
    %7 = vector.broadcast %6 : vector<1x512xf32> to vector<16x512xf32>
    %8 = arith.addf %5, %7 : vector<16x512xf32>
    %c0_6 = arith.constant 0 : index
    %c0_7 = arith.constant 0 : index
    %9 = vector.load %arg9[%c0_6, %c0_7] : memref<16x512xf32, #tpu.memory_space<vmem>>, vector<16x512xf32>
    tpu.vector_store %arg9[%c0_6, %c0_7], %8 {strides = array<i32>} : memref<16x512xf32, #tpu.memory_space<vmem>>, vector<16x512xf32>,
    return
  }
  func.func @transform_0(%arg0: i32, %arg1: i32) -> (i32, i32) {
    %c0_i32 = arith.constant 0 : i32
    %c0_i32_0 = arith.constant 0 : i32
    return %arg0, %c0_i32 : i32, i32
  }
  func.func @transform_1(%arg0: i32, %arg1: i32) -> (i32, i32) {
    %c0_i32 = arith.constant 0 : i32
    %c0_i32_0 = arith.constant 0 : i32
    %c0_i32_1 = arith.constant 0 : i32
    return %c0_i32, %c0_i32_0 : i32, i32
  }
  func.func @transform_2(%arg0: i32, %arg1: i32) -> (i32, i32) {
    %c0_i32 = arith.constant 0 : i32
    %c0_i32_0 = arith.constant 0 : i32
    %c0_i32_1 = arith.constant 0 : i32
    return %c0_i32, %c0_i32_0 : i32, i32
  }
  func.func @transform_3(%arg0: i32, %arg1: i32) -> (i32, i32) {
    %c0_i32 = arith.constant 0 : i32
    %c0_i32_0 = arith.constant 0 : i32
    %c0_i32_1 = arith.constant 0 : i32
    return %c0_i32, %c0_i32_0 : i32, i32
  }
  func.func @transform_4(%arg0: i32, %arg1: i32) -> (i32, i32) {
    %c0_i32 = arith.constant 0 : i32
    %c0_i32_0 = arith.constant 0 : i32
    %c0_i32_1 = arith.constant 0 : i32
    return %c0_i32, %c0_i32_0 : i32, i32
  }
  func.func @transform_5(%arg0: i32, %arg1: i32) -> (i32, i32) {
    %c0_i32 = arith.constant 0 : i32
    %c0_i32_0 = arith.constant 0 : i32
    return %c0_i32, %arg1 : i32, i32
  }
  func.func @transform_6(%arg0: i32, %arg1: i32) -> (i32, i32) {
    %c0_i32 = arith.constant 0 : i32
    %c0_i32_0 = arith.constant 0 : i32
    return %c0_i32, %arg1 : i32, i32
  }
  func.func @transform_7(%arg0: i32, %arg1: i32) -> (i32, i32) {
    %c0_i32 = arith.constant 0 : i32
    return %arg0, %arg1 : i32, i32
  }
}

</mosaic_0001>

<bundles_post_ra>
// kernel: tpu_custom_call.1
= control target key start
LH: loop header
LB: loop body
LE: loop exit
PB: predicated region body
PF: predicated region fallthrough
CT: control target
= control target key end

     0   :  { %s6911_s0 = inlined_call_operand.hbm [shape: bf16[16,768], index: 0, kind: input, shape index: {}]   ;;  %s6912_s1 = inlined_call_operand.hbm [shape: bf16[768,768], index: 1, kind: input, shape index: {}]   ;;  %s6913_s2 = inlined_call_operand.hbm [shape: f32[1,768], index: 2, kind: input, shape index: {}]   ;;  %s6914_s3 = inlined_call_operand.hbm [shape: f32[1,768], index: 3, kind: input, shape index: {}]   ;;  %s6915_s4 = inlined_call_operand.hbm [shape: f32[1,768], index: 4, kind: input, shape index: {}]   ;;  %s6916_s5 = inlined_call_operand.hbm [shape: bf16[768,1024], index: 5, kind: input, shape index: {}]   ;;  %s6917_s6 = inlined_call_operand.hbm [shape: f32[1,1024], index: 6, kind: input, shape index: {}]   ;;  %s6918_s7 = inlined_call_operand.hbm [shape: f32[16,1024], index: 7, kind: output, shape index: {}]  }
   0x1   :  { %6938 = sst [smem:[#allocation27_spill]] %s6912_s1 }
   0x2   :  { %6939 = sst [smem:[#allocation28_spill]] %s6914_s3 }
   0x3   :  { %6940 = sst [smem:[#allocation29_spill]] %s6916_s5 }
   0x4   :  { %12 = vsyncpa [#allocation4], 0 }
   0x5   :  { %13 = vsyncpa [#allocation7], 0 }
   0x6   :  { %14 = vsyncpa [#allocation10], 0 }
   0x7   :  { %15 = vsyncpa [#allocation13], 0 }
   0x8   :  { %17 = vsyncpa [#allocation13 + $0x1], 0 }
   0x9   :  { %18 = vsyncpa [#allocation5], 0 }
   0xa   :  { %20 = vsyncpa [#allocation5 + $0x1], 0  ;;  %s6282_s24 = smov 0   ;;  %s6284_s25 = smov 0  }
   0xb   :  { %s6286_s26 = smov 0   ;;  %s6288_s27 = smov 0  }
   0xc   :  { %s6290_s28 = smov 0   ;;  %s6292_s29 = smov 0  }
   0xd LB: > { %6941 = sst [smem:[#allocation21_spill]] %s6204_s24  ;;  %s6313_s30 = sadd.s32 4294967295, %s6224_s29   ;;  %s6224_s29 = sphi %s6292_s29, %s26_s29   ;;  %s6220_s28 = sphi %s6290_s28, %s6986_s28   ;;  %s6216_s27 = sphi %s6288_s27, %s6985_s27   ;;  %s6212_s26 = sphi %s6286_s26, %s6984_s26   ;;  %s6208_s25 = sphi %s6284_s25, %s6983_s25   ;;  %s6204_s24 = sphi %s6282_s24, %s6982_s24  }
   0xe   : > { %6942 = sst [smem:[#allocation22_spill]] %s6224_s29  ;;  %s4467_s8 = sadd.s32 4294967294, %s6224_s29  }
   0xf   : > { %p168_p0 = scmp.ne.s32.totalorder %s6208_s25, %s6204_s24  ;;  %p6919_p1 = scmp.eq.s32.totalorder %s6313_s30, 0 }
  0x10   : > { %p226_p3 = scmp.eq.s32.totalorder %s4467_s8, 1  ;;  %p4468_p5 = scmp.ge.s32.totalorder %s6224_s29, 1 }
  0x11   : > { %p6322_p4 = por %p6919_p1, %p168_p0  ;;  %p233_p7 = scmp.lt.s32.totalorder %s6224_s29, 3 }
  0x12   : > { %p6327_p6 = por %p226_p3, %p168_p0  ;;  %s6226_s12 = smov [#allocation6]  }
  0x13   : > { %s6943_s9 = scalar_select %p6322_p4, 1, 0 }
  0x14   : > { %s6944_s10 = scalar_select %p6327_p6, 1, 0 }
  0x15   : > { %p6332_p8 = pnand %p4468_p5, %p233_p7  ;;  %s262_s13 = sshll.u32 %s6226_s12, 4  ;;  %s263_s13 = int_to_ptr.vmem [resolvable:$true] %s262_s13 }
  0x16   : > { %6945 = sst [smem:[#allocation23_spill]] %s6944_s10  ;;  %s6227_s15 = smov [#allocation9]  }
  0x17   : > { %s6946_s11 = scalar_select %p6332_p8, 1, 0 }
  0x18   : > { %p5071_p10 = pneg %p6332_p8  ;;  %s287_s16 = sshll.u32 %s6227_s15, 4  ;;  %s6345_s16 = int_to_ptr.vmem [resolvable:$true] %s287_s16 }
  0x19   : > { %s6948_s1 = sld [smem:[#allocation27_spill]] }
  0x1a   : > { %p6341_p11 = pnand %p5071_p10, %p6919_p1 }
  0x1c   : > { %s6947_s14 = scalar_select %p6341_p11, 1, 0 }
  0x1d   : > { %p6355_p13 = pneg %p6341_p11 }
  0x1f   : > { %s5930_s19 = scalar_lea.hbm %s6948_s1, 36864 }
  0x20   : > { %p5931_p12 = scmp.ne.s32.totalorder %s6948_s1, %s5930_s19  ;;  %p5937_p5 = scmp.lt.u32.totalorder %s5930_s19, %s6948_s1 }
  0x22   : > { %p5933_p0 = pnand %p6355_p13, %p5931_p12 }
  0x24   : > { %p5934_p3 = pneg %p5933_p0 }
  0x26   : > { %p5939_p7 = pnand %p5937_p5, %p5934_p3 }
  0x28   : > { %5942 = shalt.err (!%p5939_p7)
}
  0x29   : > { %s5943_s12 = scalar_lea.vmem %s263_s13, 36864  ;;  %p5951_p2 = scmp.lt.s32.totalorder %s263_s13, %s263_s13 }
  0x2a   : > { %p5944_p10 = scmp.ne.s32.totalorder %s263_s13, %s5943_s12  ;;  %p5952_p6 = scmp.lt.s32.totalorder %s5943_s12, %s5943_s12 }
  0x2c   : > { %p5946_p9 = pnand %p5944_p10, %p6355_p13  ;;  %p5953_p4 = por %p5952_p6, %p5951_p2 }
  0x2e   : > { %p5947_p1 = pneg %p5946_p9 }
  0x30   : > { %p5954_p8 = pnand %p5953_p4, %p5947_p1 }
  0x32   : > { %5957 = shalt.err (!%p5954_p8)
}
  0x33   : > { %s6924_s15 = smov 384   ;;  %s6925_s17 = smov 24  }
  0x34   : > { %5077 = dma.hbm_to_vmem [thread:$0]  (!%p6341_p11), %s6948_s1, 36864, %s263_s13, [#allocation7], %s6924_s15, %s6924_s15, %s6925_s17  }
  0x35   : > { %s6950_s3 = sld [smem:[#allocation28_spill]] }
  0x3b   : > { %s5958_s23 = scalar_lea.hbm %s6950_s3, 96 }
  0x3c   : > { %p5959_p1 = scmp.ne.s32.totalorder %s6950_s3, %s5958_s23  ;;  %p5965_p6 = scmp.lt.u32.totalorder %s5958_s23, %s6950_s3 }
  0x3e   : > { %p5961_p2 = pnand %p5959_p1, %p6355_p13 }
  0x40   : > { %p5962_p4 = pneg %p5961_p2 }
  0x42   : > { %p5967_p8 = pnand %p5965_p6, %p5962_p4 }
  0x44   : > { %5970 = shalt.err (!%p5967_p8)
}
  0x45   : > { %s5971_s13 = scalar_lea.vmem %s6345_s16, 96  ;;  %p5979_p3 = scmp.lt.s32.totalorder %s6345_s16, %s6345_s16 }
  0x46   : > { %p5972_p9 = scmp.ne.s32.totalorder %s6345_s16, %s5971_s13  ;;  %p5980_p5 = scmp.lt.s32.totalorder %s5971_s13, %s5971_s13 }
  0x48   : > { %p5974_p12 = pnand %p5972_p9, %p6355_p13  ;;  %p5981_p7 = por %p5980_p5, %p5979_p3 }
  0x4a   : > { %p5975_p0 = pneg %p5974_p12 }
  0x4c   : > { %p5982_p10 = pnand %p5981_p7, %p5975_p0 }
  0x4e   : > { %5985 = shalt.err (!%p5982_p10)
}
  0x4f   : > { %5083 = dma.hbm_to_vmem [thread:$0]  (!%p6341_p11), %s6950_s3, 96, %s6345_s16, [#allocation10]  }
  0x50   : > { %s35_s18 = sadd.s32 1, %s6220_s28  ;;  %s155_s19 = sadd.s32 1, %s6212_s26 }
  0x51   : > { %p36_p1 = scmp.ge.s32.totalorder %s35_s18, 2  ;;  %p162_p2 = scmp.ne.s32.totalorder %s6212_s26, %s6208_s25 }
  0x52   : > { %p163_p4 = scmp.eq.s32.totalorder %s6224_s29, 0  ;;  %p5103_p6 = scmp.lt.s32.totalorder %s6224_s29, 2 }
  0x53   : > { %s6988_s18 = smov (%p36_p1, %s35_s18), 0  ;;  %p6952_p9 = scmp.eq.s32.totalorder %s6313_s30, 1 }
  0x54   : > { %6951 = sst [smem:[#allocation24_spill]] %s6988_s18  ;;  %p164_p8 = por %p163_p4, %p162_p2 }
  0x55   : > { %p6407_p12 = por %p6952_p9, %p162_p2  ;;  %s152_s21 = ssub.s32 %s6220_s28, %s6988_s18 }
  0x56   : > { %s309_s23 = sand.u32 1, %s6224_s29   ;;  %p153_p0 = scmp.eq.s32.totalorder %s152_s21, 0 }
  0x57   : > { %s6953_s20 = scalar_select %p6407_p12, 1, 0 }
  0x58   : > { %s6926_s16 = sand.u32 1, %s6212_s26   ;;  %s4980_s8 = sshll.u32 %s6220_s28, 8 }
  0x59   : > { %6954 = sst [smem:[#allocation25_spill]] %s6953_s20  ;;  %s5043_s13 = smul.u32 1536, %s6926_s16 }
  0x5a   : > { %s6417_s12 = scalar_select %p153_p0, %s6212_s26, %s155_s19  }
  0x5b   : > { %s6956_s5 = sld [smem:[#allocation29_spill]]  ;;  %p6426_p3 = pnand %p5103_p6, %p164_p8 }
  0x5c   : > { %6955 = sst [smem:[#allocation26_spill]] %s6417_s12  ;;  %s313_s21 = scalar_lea.vmem [#allocation12], %s5043_s13 }
  0x5d   : > { %s6957_s17 = scalar_select %p6426_p3, 1, 0 }
  0x5e   : > { %s320_s19 = sshll.u32 %s313_s21, 4  ;;  %s6432_s16 = scalar_lea.sflag [#allocation13], %s309_s23  ;;  %s6430_s19 = int_to_ptr.vmem [resolvable:$true] %s320_s19 }
  0x5f   : > { %p6933_p7 = pneg %p6426_p3 }
  0x61   : > { %s6424_s15 = scalar_lea.hbm %s6956_s5, %s4980_s8  ;;  %s5991_s10 = scalar_lea.hbm %s6956_s5, 49152 }
  0x62   : > { %s5986_s1 = scalar_lea.hbm %s6424_s15, 24576  ;;  %p5992_p2 = scmp.lt.u32.totalorder %s6424_s15, %s6956_s5 }
  0x63   : > { %p5987_p5 = scmp.ne.s32.totalorder %s6424_s15, %s5986_s1  ;;  %p5993_p4 = scmp.lt.u32.totalorder %s5991_s10, %s5986_s1 }
  0x64   : > { %p5995_p8 = scmp.lt.u32.totalorder %s5986_s1, %s6424_s15 }
  0x65   : > { %p5989_p10 = pnand %p6933_p7, %p5987_p5  ;;  %p5994_p6 = por %p5993_p4, %p5992_p2 }
  0x67   : > { %p5990_p1 = pneg %p5989_p10  ;;  %p5996_p9 = por %p5995_p8, %p5994_p6 }
  0x69   : > { %p5997_p0 = pnand %p5996_p9, %p5990_p1 }
  0x6b   : > { %6000 = shalt.err (!%p5997_p0)
}
  0x6c   : > { %s6001_s23 = scalar_lea.vmem %s6430_s19, 24576  ;;  %s6230_s13 = smov [#allocation12]  }
  0x6d   : > { %p6002_p5 = scmp.ne.s32.totalorder %s6430_s19, %s6001_s23  ;;  %s6006_s21 = sshll.u32 %s6230_s13, 4  ;;  %s6007_s21 = int_to_ptr.vmem [resolvable:$false] %s6006_s21 }
  0x6e   : > { %s6008_s3 = scalar_lea.vmem %s6007_s21, 49152  ;;  %p6009_p11 = scmp.lt.s32.totalorder %s6430_s19, %s6007_s21 }
  0x6f   : > { %p6004_p10 = pnand %p6002_p5, %p6933_p7  ;;  %p6010_p2 = scmp.lt.s32.totalorder %s6008_s3, %s6001_s23 }
  0x71   : > { %p6005_p12 = pneg %p6004_p10  ;;  %p6011_p4 = por %p6010_p2, %p6009_p11 }
  0x73   : > { %p6012_p6 = pnand %p6011_p4, %p6005_p12 }
  0x75   : > { %6015 = shalt.err (!%p6012_p6)
}
  0x76   : > { %s6231_s1 = smov 512   ;;  %s6232_s18 = smov 256  }
  0x77   : > { %s6233_s8 = smov 16   ;;  %s6234_s24 = smov [#allocation3]  }
  0x78   : > { %5090 = dma.hbm_to_vmem [thread:$0]  (!%p6426_p3), %s6424_s15, 24576, %s6430_s19, %s6432_s16, %s6231_s1, %s6232_s18, %s6233_s8  }
  0x79   : > { %s249_s10 = sshll.u32 %s6234_s24, 4  ;;  %s6016_s23 = scalar_lea.hbm %s6911_s0, 768  ;;  %s250_s10 = int_to_ptr.vmem [resolvable:$true] %s249_s10 }
  0x7a   : > { %p6017_p11 = scmp.ne.s32.totalorder %s6911_s0, %s6016_s23  ;;  %p6023_p8 = scmp.lt.u32.totalorder %s6016_s23, %s6911_s0 }
  0x7c   : > { %p6019_p12 = pnand %p6017_p11, %p6355_p13 }
  0x7e   : > { %p6020_p1 = pneg %p6019_p12 }
  0x80   : > { %p6025_p9 = pnand %p6023_p8, %p6020_p1 }
  0x82   : > { %6028 = shalt.err (!%p6025_p9)
}
  0x83   : > { %s6029_s15 = scalar_lea.vmem %s250_s10, 768  ;;  %p6037_p2 = scmp.lt.s32.totalorder %s250_s10, %s250_s10 }
  0x84   : > { %p6030_p0 = scmp.ne.s32.totalorder %s250_s10, %s6029_s15  ;;  %p6038_p4 = scmp.lt.s32.totalorder %s6029_s15, %s6029_s15 }
  0x86   : > { %p6032_p5 = pnand %p6030_p0, %p6355_p13  ;;  %p6039_p6 = por %p6038_p4, %p6037_p2 }
  0x88   : > { %p6033_p10 = pneg %p6032_p5 }
  0x8a   : > { %p6040_p7 = pnand %p6039_p6, %p6033_p10 }
  0x8c   : > { %6043 = shalt.err (!%p6040_p7)
}
  0x8d   : > { %p6958_p11 = scmp.ne.s32.totalorder %s6947_s14, 0  ;;  %s6959_s5 = smov 24  }
  0x8e   : > { %s6960_s19 = smov 384   ;;  %s6235_s1 = smov [#allocation8]  }
  0x8f   : > { %5074 = dma.hbm_to_vmem [thread:$0]  (!%p6958_p11), %s6911_s0, 768, %s250_s10, [#allocation4], %s6960_s19, %s6960_s19, %s6959_s5  }
  0x90   : > { %s276_s18 = sshll.u32 %s6235_s1, 4  ;;  %s6236_s8 = smov [#allocation11]   ;;  %s277_s18 = int_to_ptr.vmem [resolvable:$true] %s276_s18 }
  0x91   : > { %s298_s24 = sshll.u32 %s6236_s8, 4  ;;  %s6044_s21 = scalar_lea.hbm %s6913_s2, 96  ;;  %s299_s24 = int_to_ptr.vmem [resolvable:$true] %s298_s24 }
  0x92   : > { %p6045_p7 = scmp.ne.s32.totalorder %s6913_s2, %s6044_s21  ;;  %p6051_p8 = scmp.lt.u32.totalorder %s6044_s21, %s6913_s2 }
  0x94   : > { %p6047_p12 = pnand %p6045_p7, %p6355_p13 }
  0x96   : > { %p6048_p1 = pneg %p6047_p12 }
  0x98   : > { %p6053_p9 = pnand %p6051_p8, %p6048_p1 }
  0x9a   : > { %6056 = shalt.err (!%p6053_p9)
}
  0x9b   : > { %s6057_s10 = scalar_lea.vmem %s277_s18, 96  ;;  %p6065_p2 = scmp.lt.s32.totalorder %s277_s18, %s277_s18 }
  0x9c   : > { %p6058_p0 = scmp.ne.s32.totalorder %s277_s18, %s6057_s10  ;;  %p6066_p4 = scmp.lt.s32.totalorder %s6057_s10, %s6057_s10 }
  0x9e   : > { %p6060_p5 = pnand %p6058_p0, %p6355_p13  ;;  %p6067_p6 = por %p6066_p4, %p6065_p2 }
  0xa0   : > { %p6061_p10 = pneg %p6060_p5 }
  0xa2   : > { %p6068_p3 = pnand %p6067_p6, %p6061_p10 }
  0xa4   : > { %6071 = shalt.err (!%p6068_p3)
}
  0xa5   : > { %5080 = dma.hbm_to_vmem [thread:$0]  (!%p6958_p11), %s6913_s2, 96, %s277_s18, [#allocation7]  }
  0xa6   : > { %s6961_s20 = sand.u32 1, %s6212_s26   ;;  %s6072_s13 = scalar_lea.hbm %s6915_s4, 96 }
  0xa7   : > { %s4477_s12 = sshll.u32 %s6961_s20, 2  ;;  %p6073_p7 = scmp.ne.s32.totalorder %s6915_s4, %s6072_s13 }
  0xa8   : > { %p6079_p1 = scmp.lt.u32.totalorder %s6072_s13, %s6915_s4 }
  0xa9   : > { %p6075_p3 = pnand %p6073_p7, %p6355_p13 }
  0xab   : > { %p6076_p12 = pneg %p6075_p3 }
  0xad   : > { %p6081_p8 = pnand %p6079_p1, %p6076_p12 }
  0xaf   : > { %6084 = shalt.err (!%p6081_p8)
}
  0xb0   : > { %s6085_s18 = scalar_lea.vmem %s299_s24, 96  ;;  %p6093_p10 = scmp.lt.s32.totalorder %s299_s24, %s299_s24 }
  0xb1   : > { %p6086_p9 = scmp.ne.s32.totalorder %s299_s24, %s6085_s18  ;;  %p6094_p2 = scmp.lt.s32.totalorder %s6085_s18, %s6085_s18 }
  0xb3   : > { %p6088_p0 = pnand %p6086_p9, %p6355_p13  ;;  %p6095_p4 = por %p6094_p2, %p6093_p10 }
  0xb5   : > { %p6089_p5 = pneg %p6088_p0 }
  0xb7   : > { %p6096_p6 = pnand %p6095_p4, %p6089_p5 }
  0xb9   : > { %6099 = shalt.err (!%p6096_p6)
}
  0xba   : > { %5086 = dma.hbm_to_vmem [thread:$0]  (!%p6958_p11), %s6915_s4, 96, %s299_s24, [#allocation10]  }
  0xbb   : > { %s4981_s5 = sshll.u32 %s6220_s28, 6  ;;  %s334_s1 = scalar_lea.vmem [#allocation14], %s4477_s12 }
  0xbc   : > { %s6523_s22 = scalar_lea.hbm %s6917_s6, %s4981_s5  ;;  %s342_s8 = sshll.u32 %s334_s1, 4  ;;  %s343_s8 = int_to_ptr.vmem [resolvable:$true] %s342_s8 }
  0xbd   : > { %s6100_s14 = scalar_lea.hbm %s6523_s22, 64  ;;  %p6962_p7 = scmp.ne.s32.totalorder %s6957_s17, 0 }
  0xbe   : > { %p6101_p13 = scmp.ne.s32.totalorder %s6523_s22, %s6100_s14  ;;  %s6105_s23 = scalar_lea.hbm %s6917_s6, 128 }
  0xbf   : > { %p6963_p3 = pneg %p6962_p7  ;;  %p6106_p11 = scmp.lt.u32.totalorder %s6523_s22, %s6917_s6 }
  0xc0   : > { %p6107_p8 = scmp.lt.u32.totalorder %s6105_s23, %s6100_s14  ;;  %p6109_p0 = scmp.lt.u32.totalorder %s6100_s14, %s6523_s22 }
  0xc1   : > { %p6103_p12 = pnand %p6101_p13, %p6963_p3 }
  0xc2   : > { %p6108_p9 = por %p6107_p8, %p6106_p11 }
  0xc3   : > { %p6104_p1 = pneg %p6103_p12 }
  0xc4   : > { %p6110_p5 = por %p6109_p0, %p6108_p9 }
  0xc6   : > { %p6111_p10 = pnand %p6110_p5, %p6104_p1 }
  0xc8   : > { %6114 = shalt.err (!%p6111_p10)
}
  0xc9   : > { %s6115_s12 = scalar_lea.vmem %s343_s8, 64  ;;  %p6964_p4 = pmov %p6963_p3 }
  0xca   : > { %p6116_p2 = scmp.ne.s32.totalorder %s343_s8, %s6115_s12  ;;  %s6237_s15 = smov [#allocation14]  }
  0xcb   : > { %s6120_s18 = sshll.u32 %s6237_s15, 4  ;;  %s6121_s18 = int_to_ptr.vmem [resolvable:$false] %s6120_s18 }
  0xcc   : > { %p6118_p6 = pnand %p6116_p2, %p6964_p4  ;;  %s6122_s29 = scalar_lea.vmem %s6121_s18, 128 }
  0xcd   : > { %p6123_p3 = scmp.lt.s32.totalorder %s343_s8, %s6121_s18  ;;  %p6124_p12 = scmp.lt.s32.totalorder %s6122_s29, %s6115_s12 }
  0xce   : > { %p6119_p13 = pneg %p6118_p6 }
  0xcf   : > { %p6125_p8 = por %p6124_p12, %p6123_p3 }
  0xd1   : > { %p6126_p11 = pnand %p6125_p8, %p6119_p13 }
  0xd3   : > { %6129 = shalt.err (!%p6126_p11)
}
  0xd4   : > { %5093 = dma.hbm_to_vmem [thread:$0]  (!%p6962_p7), %s6523_s22, 64, %s343_s8, %s6432_s16  }
  0xd5   : > { %p6965_p1 = scmp.ne.s32.totalorder %s6946_s11, 0 }
  0xd6   : > { %p6966_p9 = scmp.eq.s32.totalorder (!%p6965_p1), %s6313_s30, 0 }
  0xd7   : > { %351 = sbr.rel (%p6965_p1) target bundleno = 1551 (0x60f), region = 48 }
  0xde   : > { %6183 = dma.done.wait (%p6966_p9), [#allocation4], 768   ;;  %p6967_p0 = pmov %p6966_p9 }
  0xe0   : > { %6185 = vsyncadd (%p6967_p0), [#allocation4], 4294966528  ;;  %p6968_p5 = pmov %p6967_p0 }
  0xe1   : > { %p6969_p10 = pmov %p6967_p0 }
  0xe2   : > { %6187 = dma.done.wait (%p6968_p5), [#allocation7], 36960  }
  0xe3   : > { %6189 = vsyncadd (%p6969_p10), [#allocation7], 4294930336  ;;  %p6970_p2 = pmov %p6967_p0 }
  0xe4   : > { %p6971_p7 = pmov %p6967_p0 }
  0xe5   : > { %6191 = dma.done.wait (%p6970_p2), [#allocation10], 192  }
  0xe6   : > { %6193 = vsyncadd (%p6971_p7), [#allocation10], 4294967104  ;;  %s373_s11 = sand.u32 1, %s6313_s30   ;;  %s6561_s17 = sand.u32 1, %s6208_s25  }
  0xe7   : > { %s5044_s16 = smul.u32 1536, %s6561_s17  ;;  %s374_s10 = scalar_lea.sflag [#allocation13], %s373_s11 }
  0xe8   : > { %p6972_p4 = scmp.ne.s32.totalorder %s6943_s9, 0 }
  0xe9   : > { %s6564_s5 = scalar_lea.vmem [#allocation12], %s5044_s16 }
  0xea   : > { %6195 = dma.done.wait (%p6972_p4), %s374_s10, 24640  }
  0xeb   : > { %6197 = vsyncadd (%p6972_p4), %s374_s10, 4294942656  ;;  %s4486_s19 = sshll.u32 %s6561_s17, 2  ;;  %s4487_s20 = sshll.u32 %s6561_s17, 6 }
  0xec   : > { %s6572_s22 = scalar_lea.vmem [#allocation14], %s4486_s19  ;;  %s6574_s1 = scalar_lea.vmem [#allocation15], %s4487_s20 }
  0xed   : > { %p4488_p6 = scmp.ne.s32.totalorder %s6216_s27, 0 }
  0xee   : > { %v5171_v0 = vld [vmem:[#allocation6 + $0x4] ss:$24 sps:$4 sm:$0xff] (!%p4488_p6)   ;;  %v5175_v2 = vld [vmem:[#allocation6] ss:$24 sps:$4 sm:$0xff] (!%p4488_p6)   ;;  %v5177_v4 = vld [vmem:[#allocation6 + $0x34] ss:$24 sps:$4 sm:$0xff] (!%p4488_p6)  }
  0xef   : > { %430 = sbr.rel (%p4488_p6) target bundleno = 1125 (0x465), region = 80  ;;  %v5173_v1 = vld [vmem:[#allocation6 + $0x304] ss:$24 sps:$4 sm:$0xff] (!%p4488_p6)   ;;  %2227 = vmatprep.subr.bf16.mxu1 (!%p4488_p6), %v5171_v0  ;;  %v5176_v3 = vld [vmem:[#allocation6 + $0x300] ss:$24 sps:$4 sm:$0xff] (!%p4488_p6)  }
  0xf0   : > { %2270 = vmatprep.subr.bf16.mxu0 (!%p4488_p6), %v5173_v1  ;;  %2228 = vmatpush1.bf16.msra.mxu1 (!%p4488_p6), %v5175_v2  ;;  %v5179_v5 = vld [vmem:[#allocation6 + $0x334] ss:$24 sps:$4 sm:$0xff] (!%p4488_p6)   ;;  %v5181_v6 = vld [vmem:[#allocation6 + $0x30] ss:$24 sps:$4 sm:$0xff] (!%p4488_p6)   ;;  %v5183_v8 = vld [vmem:[#allocation6 + $0x64] ss:$24 sps:$4 sm:$0xff] (!%p4488_p6)  }
  0xf1   : > { %2271 = vmatpush1.bf16.msra.mxu0 (!%p4488_p6), %v5176_v3  ;;  %2229 = vmatprep.subr.bf16.mxu1 (!%p4488_p6), %v5177_v4  ;;  %v5182_v7 = vld [vmem:[#allocation6 + $0x330] ss:$24 sps:$4 sm:$0xff] (!%p4488_p6)   ;;  %v5185_v9 = vld [vmem:[#allocation6 + $0x364] ss:$24 sps:$4 sm:$0xff] (!%p4488_p6)   ;;  %v5187_v10 = vld [vmem:[#allocation6 + $0x60] ss:$24 sps:$4 sm:$0xff] (!%p4488_p6)  }
  0xf2   : > { %2272 = vmatprep.subr.bf16.mxu0 (!%p4488_p6), %v5179_v5  ;;  %v5188_v11 = vld [vmem:[#allocation6 + $0x360] ss:$24 sps:$4 sm:$0xff] (!%p4488_p6)   ;;  %v5189_v12 = vld [vmem:[#allocation6 + $0x94] ss:$24 sps:$4 sm:$0xff] (!%p4488_p6)   ;;  %v5193_v14 = vld [vmem:[#allocation6 + $0x90] ss:$24 sps:$4 sm:$0xff] (!%p4488_p6)  }
  0xf3   : > { %v5191_v13 = vld [vmem:[#allocation6 + $0x394] ss:$24 sps:$4 sm:$0xff] (!%p4488_p6)   ;;  %v5194_v15 = vld [vmem:[#allocation6 + $0x390] ss:$24 sps:$4 sm:$0xff] (!%p4488_p6)   ;;  %v5195_v16 = vld [vmem:[#allocation6 + $0xc4] ss:$24 sps:$4 sm:$0xff] (!%p4488_p6)  }
  0xf4   : > { %2230 = vmatpush1.bf16.msra.mxu1 (!%p4488_p6), %v5181_v6  ;;  %v5197_v17 = vld [vmem:[#allocation6 + $0x3c4] ss:$24 sps:$4 sm:$0xff] (!%p4488_p6)   ;;  %v5199_v18 = vld [vmem:[#allocation6 + $0xc0] ss:$24 sps:$4 sm:$0xff] (!%p4488_p6)   ;;  %v5201_v20 = vld [vmem:[#allocation6 + $0xf4] ss:$24 sps:$4 sm:$0xff] (!%p4488_p6)  }
  0xf5   : > { %2273 = vmatpush1.bf16.msra.mxu0 (!%p4488_p6), %v5182_v7  ;;  %2231 = vmatprep.subr.bf16.mxu1 (!%p4488_p6), %v5183_v8  ;;  %v5200_v19 = vld [vmem:[#allocation6 + $0x3c0] ss:$24 sps:$4 sm:$0xff] (!%p4488_p6)   ;;  %v5203_v21 = vld [vmem:[#allocation6 + $0x3f4] ss:$24 sps:$4 sm:$0xff] (!%p4488_p6)   ;;  %v5205_v22 = vld [vmem:[#allocation6 + $0xf0] ss:$24 sps:$4 sm:$0xff] (!%p4488_p6)  }
  0xf6   : > { %2274 = vmatprep.subr.bf16.mxu0 %v5185_v9  ;;  %v5206_v23 = vld [vmem:[#allocation6 + $0x3f0] ss:$24 sps:$4 sm:$0xff]   ;;  %v5207_v24 = vld [vmem:[#allocation6 + $0x124] ss:$24 sps:$4 sm:$0xff]   ;;  %v5211_v26 = vld [vmem:[#allocation6 + $0x120] ss:$24 sps:$4 sm:$0xff]  }
  0xf7   : > { %v5209_v25 = vld [vmem:[#allocation6 + $0x424] ss:$24 sps:$4 sm:$0xff]   ;;  %v5212_v27 = vld [vmem:[#allocation6 + $0x420] ss:$24 sps:$4 sm:$0xff]   ;;  %v5213_v28 = vld [vmem:[#allocation6 + $0x154] ss:$24 sps:$4 sm:$0xff]  }
  0xf8   : > { %2232 = vmatpush1.bf16.msra.mxu1 %v5187_v10  ;;  %v5215_v29 = vld [vmem:[#allocation6 + $0x454] ss:$24 sps:$4 sm:$0xff]   ;;  %v5217_v30 = vld [vmem:[#allocation6 + $0x150] ss:$24 sps:$4 sm:$0xff]   ;;  %v5219_v32 = vld [vmem:[#allocation6 + $0x184] ss:$24 sps:$4 sm:$0xff]  }
  0xf9   : > { %2275 = vmatpush1.bf16.msra.mxu0 %v5188_v11  ;;  %2233 = vmatprep.subr.bf16.mxu1 %v5189_v12  ;;  %v5218_v31 = vld [vmem:[#allocation6 + $0x450] ss:$24 sps:$4 sm:$0xff]   ;;  %v5221_v33 = vld [vmem:[#allocation6 + $0x484] ss:$24 sps:$4 sm:$0xff]   ;;  %v5223_v34 = vld [vmem:[#allocation6 + $0x180] ss:$24 sps:$4 sm:$0xff]  }
  0xfa   : > { %2276 = vmatprep.subr.bf16.mxu0 %v5191_v13  ;;  %v5224_v35 = vld [vmem:[#allocation6 + $0x480] ss:$24 sps:$4 sm:$0xff]   ;;  %v5225_v36 = vld [vmem:[#allocation6 + $0x1b4] ss:$24 sps:$4 sm:$0xff]   ;;  %v5229_v38 = vld [vmem:[#allocation6 + $0x1b0] ss:$24 sps:$4 sm:$0xff]  }
  0xfb   : > { %v5227_v37 = vld [vmem:[#allocation6 + $0x4b4] ss:$24 sps:$4 sm:$0xff]   ;;  %v5230_v39 = vld [vmem:[#allocation6 + $0x4b0] ss:$24 sps:$4 sm:$0xff]   ;;  %v5231_v40 = vld [vmem:[#allocation6 + $0x1e4] ss:$24 sps:$4 sm:$0xff]  }
  0xfc   : > { %2234 = vmatpush1.bf16.msra.mxu1 %v5193_v14  ;;  %v5233_v41 = vld [vmem:[#allocation6 + $0x4e4] ss:$24 sps:$4 sm:$0xff]   ;;  %v5235_v42 = vld [vmem:[#allocation6 + $0x1e0] ss:$24 sps:$4 sm:$0xff]   ;;  %v5237_v44 = vld [vmem:[#allocation6 + $0x214] ss:$24 sps:$4 sm:$0xff]  }
  0xfd   : > { %2277 = vmatpush1.bf16.msra.mxu0 %v5194_v15  ;;  %2235 = vmatprep.subr.bf16.mxu1 %v5195_v16  ;;  %v5236_v43 = vld [vmem:[#allocation6 + $0x4e0] ss:$24 sps:$4 sm:$0xff]   ;;  %v5239_v45 = vld [vmem:[#allocation6 + $0x514] ss:$24 sps:$4 sm:$0xff]   ;;  %v5241_v46 = vld [vmem:[#allocation6 + $0x210] ss:$24 sps:$4 sm:$0xff]  }
  0xfe   : > { %2278 = vmatprep.subr.bf16.mxu0 %v5197_v17  ;;  %v5242_v47 = vld [vmem:[#allocation6 + $0x510] ss:$24 sps:$4 sm:$0xff]   ;;  %v6577_v48 = vld [vmem:[#allocation3 + $0x4] ss:$24 sps:$4 sm:$0xff]   ;;  %v5243_v50 = vld [vmem:[#allocation6 + $0x244] ss:$24 sps:$4 sm:$0xff]  }
  0xff   : > { %v6579_v49 = vld [vmem:[#allocation3 + $0xc] ss:$24 sps:$4 sm:$0xff]   ;;  %2259 = vmatprep.mubr.bf16.mxu1 %v6577_v48  ;;  %v5247_v52 = vld [vmem:[#allocation6 + $0x240] ss:$24 sps:$4 sm:$0xff]   ;;  %v5253_v56 = vld [vmem:[#allocation6 + $0x270] ss:$24 sps:$4 sm:$0xff]  }
 0x100   : > { %2236 = vmatpush1.bf16.msra.mxu1 %v5199_v18  ;;  %v5245_v51 = vld [vmem:[#allocation6 + $0x544] ss:$24 sps:$4 sm:$0xff]   ;;  %2302 = vmatprep.mubr.bf16.mxu0 %v6579_v49  ;;  %v5248_v53 = vld [vmem:[#allocation6 + $0x540] ss:$24 sps:$4 sm:$0xff]   ;;  %v5249_v54 = vld [vmem:[#allocation6 + $0x274] ss:$24 sps:$4 sm:$0xff]  }
 0x101   : > { %2279 = vmatpush1.bf16.msra.mxu0 %v5200_v19  ;;  %2237 = vmatprep.subr.bf16.mxu1 %v5201_v20  ;;  %v5251_v55 = vld [vmem:[#allocation6 + $0x574] ss:$24 sps:$4 sm:$0xff]   ;;  %v5254_v57 = vld [vmem:[#allocation6 + $0x570] ss:$24 sps:$4 sm:$0xff]   ;;  %v5255_v58 = vld [vmem:[#allocation6 + $0x2a4] ss:$24 sps:$4 sm:$0xff]  }
 0x102   : > { %2280 = vmatprep.subr.bf16.mxu0 %v5203_v21  ;;  %v5257_v59 = vld [vmem:[#allocation6 + $0x5a4] ss:$24 sps:$4 sm:$0xff]   ;;  %v5259_v60 = vld [vmem:[#allocation6 + $0x2a0] ss:$24 sps:$4 sm:$0xff]   ;;  %v5261_v62 = vld [vmem:[#allocation6 + $0x2d4] ss:$24 sps:$4 sm:$0xff]  }
 0x103   : > { %v5260_v61 = vld [vmem:[#allocation6 + $0x5a0] ss:$24 sps:$4 sm:$0xff]   ;;  %v5263_v63 = vld [vmem:[#allocation6 + $0x5d4] ss:$24 sps:$4 sm:$0xff]   ;;  %v5265_v0 = vld [vmem:[#allocation6 + $0x2d0] ss:$24 sps:$4 sm:$0xff]  }
 0x104   : > { %2238 = vmatpush1.bf16.msra.mxu1 %v5205_v22  ;;  %v5266_v1 = vld [vmem:[#allocation6 + $0x5d0] ss:$24 sps:$4 sm:$0xff]   ;;  %v5273_v2 = vld [vmem:[#allocation6 + $0x604] ss:$24 sps:$4 sm:$0xff]   ;;  %v5271_v4 = vld [vmem:[#allocation6 + $0x600] ss:$24 sps:$4 sm:$0xff]  }
 0x105   : > { %2281 = vmatpush1.bf16.msra.mxu0 %v5206_v23  ;;  %2239 = vmatprep.subr.bf16.mxu1 %v5207_v24  ;;  %v5276_v3 = vld [vmem:[#allocation6 + $0xc] ss:$24 sps:$4 sm:$0xff]   ;;  %v5274_v5 = vld [vmem:[#allocation6 + $0x8] ss:$24 sps:$4 sm:$0xff]   ;;  %v6585_v7 = vld [vmem:[#allocation3 + $0x8] ss:$24 sps:$4 sm:$0xff]  }
 0x106   : > { %2282 = vmatprep.subr.bf16.mxu0 %v5209_v25  ;;  %v6583_v6 = vld [vmem:[#allocation3] ss:$24 sps:$4 sm:$0xff]   ;;  %v5281_v8 = vld [vmem:[#allocation6 + $0x634] ss:$24 sps:$4 sm:$0xff]   ;;  %v5287_v12 = vld [vmem:[#allocation6 + $0x664] ss:$24 sps:$4 sm:$0xff]  }
 0x107   : > { %v5284_v9 = vld [vmem:[#allocation6 + $0x3c] ss:$24 sps:$4 sm:$0xff]   ;;  %v5279_v10 = vld [vmem:[#allocation6 + $0x630] ss:$24 sps:$4 sm:$0xff]   ;;  %v5290_v13 = vld [vmem:[#allocation6 + $0x6c] ss:$24 sps:$4 sm:$0xff]  }
 0x108   : > { %2240 = vmatpush1.bf16.msra.mxu1 %v5211_v26  ;;  %v5282_v11 = vld [vmem:[#allocation6 + $0x38] ss:$24 sps:$4 sm:$0xff]   ;;  %v5288_v15 = vld [vmem:[#allocation6 + $0x68] ss:$24 sps:$4 sm:$0xff]   ;;  %v5293_v16 = vld [vmem:[#allocation6 + $0x694] ss:$24 sps:$4 sm:$0xff]  }
 0x109   : > { %2283 = vmatpush1.bf16.msra.mxu0 %v5212_v27  ;;  %2241 = vmatprep.subr.bf16.mxu1 %v5213_v28  ;;  %v5285_v14 = vld [vmem:[#allocation6 + $0x660] ss:$24 sps:$4 sm:$0xff]   ;;  %v5296_v17 = vld [vmem:[#allocation6 + $0x9c] ss:$24 sps:$4 sm:$0xff]   ;;  %v5291_v18 = vld [vmem:[#allocation6 + $0x690] ss:$24 sps:$4 sm:$0xff]  }
 0x10a   : > { %2284 = vmatprep.subr.bf16.mxu0 %v5215_v29  ;;  %v5294_v19 = vld [vmem:[#allocation6 + $0x98] ss:$24 sps:$4 sm:$0xff]   ;;  %v5299_v20 = vld [vmem:[#allocation6 + $0x6c4] ss:$24 sps:$4 sm:$0xff]   ;;  %v5300_v23 = vld [vmem:[#allocation6 + $0xc8] ss:$24 sps:$4 sm:$0xff]  }
 0x10b   : > { %v5302_v21 = vld [vmem:[#allocation6 + $0xcc] ss:$24 sps:$4 sm:$0xff]   ;;  %v5297_v22 = vld [vmem:[#allocation6 + $0x6c0] ss:$24 sps:$4 sm:$0xff]   ;;  %v5308_v25 = vld [vmem:[#allocation6 + $0xfc] ss:$24 sps:$4 sm:$0xff]  }
 0x10c   : > { %2242 = vmatpush1.bf16.msra.mxu1 %v5217_v30  ;;  %v5305_v24 = vld [vmem:[#allocation6 + $0x6f4] ss:$24 sps:$4 sm:$0xff]   ;;  %v5303_v26 = vld [vmem:[#allocation6 + $0x6f0] ss:$24 sps:$4 sm:$0xff]   ;;  %v5311_v28 = vld [vmem:[#allocation6 + $0x724] ss:$24 sps:$4 sm:$0xff]  }
 0x10d   : > { %2285 = vmatpush1.bf16.msra.mxu0 %v5218_v31  ;;  %2243 = vmatprep.subr.bf16.mxu1 %v5219_v32  ;;  %v5306_v27 = vld [vmem:[#allocation6 + $0xf8] ss:$24 sps:$4 sm:$0xff]   ;;  %v5314_v29 = vld [vmem:[#allocation6 + $0x12c] ss:$24 sps:$4 sm:$0xff]   ;;  %v5312_v31 = vld [vmem:[#allocation6 + $0x128] ss:$24 sps:$4 sm:$0xff]  }
 0x10e   : > { %2286 = vmatprep.subr.bf16.mxu0 %v5221_v33  ;;  %v5309_v30 = vld [vmem:[#allocation6 + $0x720] ss:$24 sps:$4 sm:$0xff]   ;;  %v5317_v32 = vld [vmem:[#allocation6 + $0x754] ss:$24 sps:$4 sm:$0xff]  }
 0x10f   : > { %v5320_v33 = vld [vmem:[#allocation6 + $0x15c] ss:$24 sps:$4 sm:$0xff]  }
 0x110   : > { %2244 = vmatpush1.bf16.msra.mxu1 %v5223_v34  ;;  %v6590_v34 = vld [vmem:[#allocation3 + $0x14] ss:$24 sps:$4 sm:$0xff]  }
 0x111   : > { %2287 = vmatpush1.bf16.msra.mxu0 %v5224_v35  ;;  %2245 = vmatprep.subr.bf16.mxu1 %v5225_v36  ;;  %v5315_v35 = vld [vmem:[#allocation6 + $0x750] ss:$24 sps:$4 sm:$0xff]  }
 0x112   : > { %2288 = vmatprep.subr.bf16.mxu0 %v5227_v37  ;;  %v5318_v36 = vld [vmem:[#allocation6 + $0x158] ss:$24 sps:$4 sm:$0xff]   ;;  %v5323_v37 = vld [vmem:[#allocation6 + $0x784] ss:$24 sps:$4 sm:$0xff]  }
 0x114   : > { %2246 = vmatpush1.bf16.msra.mxu1 %v5229_v38  ;;  %v5326_v38 = vld [vmem:[#allocation6 + $0x18c] ss:$24 sps:$4 sm:$0xff]  }
 0x115   : > { %2289 = vmatpush1.bf16.msra.mxu0 %v5230_v39  ;;  %2247 = vmatprep.subr.bf16.mxu1 %v5231_v40  ;;  %v5321_v39 = vld [vmem:[#allocation6 + $0x780] ss:$24 sps:$4 sm:$0xff]  }
 0x116   : > { %2290 = vmatprep.subr.bf16.mxu0 %v5233_v41  ;;  %v5324_v40 = vld [vmem:[#allocation6 + $0x188] ss:$24 sps:$4 sm:$0xff]   ;;  %v5329_v41 = vld [vmem:[#allocation6 + $0x7b4] ss:$24 sps:$4 sm:$0xff]  }
 0x118   : > { %2248 = vmatpush1.bf16.msra.mxu1 %v5235_v42  ;;  %v5332_v42 = vld [vmem:[#allocation6 + $0x1bc] ss:$24 sps:$4 sm:$0xff]  }
 0x119   : > { %2291 = vmatpush1.bf16.msra.mxu0 %v5236_v43  ;;  %2249 = vmatprep.subr.bf16.mxu1 %v5237_v44  ;;  %v5327_v43 = vld [vmem:[#allocation6 + $0x7b0] ss:$24 sps:$4 sm:$0xff]  }
 0x11a   : > { %2292 = vmatprep.subr.bf16.mxu0 %v5239_v45  ;;  %v5330_v44 = vld [vmem:[#allocation6 + $0x1b8] ss:$24 sps:$4 sm:$0xff]   ;;  %v5335_v45 = vld [vmem:[#allocation6 + $0x7e4] ss:$24 sps:$4 sm:$0xff]  }
 0x11c   : > { %2250 = vmatpush1.bf16.msra.mxu1 %v5241_v46  ;;  %v5338_v46 = vld [vmem:[#allocation6 + $0x1ec] ss:$24 sps:$4 sm:$0xff]  }
 0x11d   : > { %2293 = vmatpush1.bf16.msra.mxu0 %v5242_v47  ;;  %2251 = vmatprep.subr.bf16.mxu1 %v5243_v50  ;;  %v5333_v47 = vld [vmem:[#allocation6 + $0x7e0] ss:$24 sps:$4 sm:$0xff]  }
 0x11e   : > { %2294 = vmatprep.subr.bf16.mxu0 %v5245_v51  ;;  %v5336_v50 = vld [vmem:[#allocation6 + $0x1e8] ss:$24 sps:$4 sm:$0xff]   ;;  %v5341_v51 = vld [vmem:[#allocation6 + $0x814] ss:$24 sps:$4 sm:$0xff]  }
 0x120   : > { %2252 = vmatpush1.bf16.msra.mxu1 %v5247_v52  ;;  %v5344_v52 = vld [vmem:[#allocation6 + $0x21c] ss:$24 sps:$4 sm:$0xff]  }
 0x121   : > { %2295 = vmatpush1.bf16.msra.mxu0 %v5248_v53  ;;  %2253 = vmatprep.subr.bf16.mxu1 %v5249_v54  ;;  %v5339_v53 = vld [vmem:[#allocation6 + $0x810] ss:$24 sps:$4 sm:$0xff]  }
 0x122   : > { %2296 = vmatprep.subr.bf16.mxu0 %v5251_v55  ;;  %v5342_v54 = vld [vmem:[#allocation6 + $0x218] ss:$24 sps:$4 sm:$0xff]   ;;  %v5347_v55 = vld [vmem:[#allocation6 + $0x844] ss:$24 sps:$4 sm:$0xff]  }
 0x124   : > { %2254 = vmatpush1.bf16.msra.mxu1 %v5253_v56  ;;  %v5350_v56 = vld [vmem:[#allocation6 + $0x24c] ss:$24 sps:$4 sm:$0xff]  }
 0x125   : > { %2297 = vmatpush1.bf16.msra.mxu0 %v5254_v57  ;;  %2255 = vmatprep.subr.bf16.mxu1 %v5255_v58  ;;  %v5345_v57 = vld [vmem:[#allocation6 + $0x840] ss:$24 sps:$4 sm:$0xff]  }
 0x126   : > { %2298 = vmatprep.subr.bf16.mxu0 %v5257_v59  ;;  %v5348_v58 = vld [vmem:[#allocation6 + $0x248] ss:$24 sps:$4 sm:$0xff]   ;;  %v5353_v59 = vld [vmem:[#allocation6 + $0x874] ss:$24 sps:$4 sm:$0xff]  }
 0x128   : > { %2256 = vmatpush1.bf16.msra.mxu1 %v5259_v60  ;;  %v5356_v60 = vld [vmem:[#allocation6 + $0x27c] ss:$24 sps:$4 sm:$0xff]  }
 0x129   : > { %2299 = vmatpush1.bf16.msra.mxu0 %v5260_v61  ;;  %2257 = vmatprep.subr.bf16.mxu1 %v5261_v62  ;;  %v5351_v61 = vld [vmem:[#allocation6 + $0x870] ss:$24 sps:$4 sm:$0xff]  }
 0x12a   : > { %2300 = vmatprep.subr.bf16.mxu0 %v5263_v63  ;;  %v5354_v62 = vld [vmem:[#allocation6 + $0x278] ss:$24 sps:$4 sm:$0xff]   ;;  %v5359_v63 = vld [vmem:[#allocation6 + $0x8a4] ss:$24 sps:$4 sm:$0xff]  }
 0x12c   : > { %2258 = vmatpush1.bf16.msra.mxu1 %v5265_v0  ;;  %v5362_v0 = vld [vmem:[#allocation6 + $0x2ac] ss:$24 sps:$4 sm:$0xff]  }
 0x12d   : > { %2301 = vmatpush1.bf16.msra.mxu0 %v5266_v1  ;;  %2356 = vmatprep.subr.bf16.mxu1 %v5276_v3  ;;  %v5357_v1 = vld [vmem:[#allocation6 + $0x8a0] ss:$24 sps:$4 sm:$0xff]   ;;  %v5365_v3 = vld [vmem:[#allocation6 + $0x8d4] ss:$24 sps:$4 sm:$0xff]  }
 0x12e   : > { %2313 = vmatprep.subr.bf16.mxu0 %v5273_v2  ;;  %v5360_v2 = vld [vmem:[#allocation6 + $0x2a8] ss:$24 sps:$4 sm:$0xff]  }
 0x12f   : > { %2260 = vmatmul.mubr.bf16.vlgmr.msra.gmra.mrb[0].mxu1 %v6583_v6 }
 0x130   : > { %2303 = vmatmul.mubr.bf16.vlgmr.msra.gmra.mrb[0].mxu0 %v6585_v7  ;;  %2357 = vmatpush1.bf16.msra.mxu1 %v5274_v5  ;;  %v5363_v5 = vld [vmem:[#allocation6 + $0x8d0] ss:$24 sps:$4 sm:$0xff]  }
 0x131   : > { %2314 = vmatpush1.bf16.msra.mxu0 %v5271_v4  ;;  %2358 = vmatprep.subr.bf16.mxu1 %v5284_v9  ;;  %v5368_v4 = vld [vmem:[#allocation6 + $0x2dc] ss:$24 sps:$4 sm:$0xff]   ;;  %v5374_v9 = vld [vmem:[#allocation6 + $0x30c] ss:$24 sps:$4 sm:$0xff]  }
 0x132   : > { %2315 = vmatprep.subr.bf16.mxu0 %v5281_v8  ;;  %2388 = vmatprep.mubr.bf16.mxu1 %v6577_v48  ;;  %v5366_v8 = vld [vmem:[#allocation6 + $0x2d8] ss:$24 sps:$4 sm:$0xff]  }
 0x133   : > { %2345 = vmatprep.mubr.bf16.mxu0 %v6590_v34 }
 0x134   : > { %2359 = vmatpush1.bf16.msra.mxu1 %v5282_v11  ;;  %v6593_v11 = vld [vmem:[#allocation3 + $0x10] ss:$24 sps:$4 sm:$0xff]  }
 0x135   : > { %2316 = vmatpush1.bf16.msra.mxu0 %v5279_v10  ;;  %2360 = vmatprep.subr.bf16.mxu1 %v5290_v13  ;;  %v5377_v10 = vld [vmem:[#allocation6 + $0x14] ss:$24 sps:$4 sm:$0xff]   ;;  %v5375_v13 = vld [vmem:[#allocation6 + $0x10] ss:$24 sps:$4 sm:$0xff]  }
 0x136   : > { %2317 = vmatprep.subr.bf16.mxu0 %v5287_v12  ;;  %v5372_v12 = vld [vmem:[#allocation6 + $0x308] ss:$24 sps:$4 sm:$0xff]  }
 0x138   : > { %2361 = vmatpush1.bf16.msra.mxu1 %v5288_v15  ;;  %v5383_v15 = vld [vmem:[#allocation6 + $0x44] ss:$24 sps:$4 sm:$0xff]  }
 0x139   : > { %2318 = vmatpush1.bf16.msra.mxu0 %v5285_v14  ;;  %2362 = vmatprep.subr.bf16.mxu1 %v5296_v17  ;;  %v5380_v14 = vld [vmem:[#allocation6 + $0x33c] ss:$24 sps:$4 sm:$0xff]   ;;  %v5381_v17 = vld [vmem:[#allocation6 + $0x40] ss:$24 sps:$4 sm:$0xff]  }
 0x13a   : > { %2319 = vmatprep.subr.bf16.mxu0 %v5293_v16  ;;  %v5378_v16 = vld [vmem:[#allocation6 + $0x338] ss:$24 sps:$4 sm:$0xff]  }
 0x13c   : > { %2363 = vmatpush1.bf16.msra.mxu1 %v5294_v19  ;;  %v5389_v19 = vld [vmem:[#allocation6 + $0x74] ss:$24 sps:$4 sm:$0xff]  }
 0x13d   : > { %2320 = vmatpush1.bf16.msra.mxu0 %v5291_v18  ;;  %2364 = vmatprep.subr.bf16.mxu1 %v5302_v21  ;;  %v5386_v18 = vld [vmem:[#allocation6 + $0x36c] ss:$24 sps:$4 sm:$0xff]   ;;  %v5387_v21 = vld [vmem:[#allocation6 + $0x70] ss:$24 sps:$4 sm:$0xff]  }
 0x13e   : > { %2321 = vmatprep.subr.bf16.mxu0 %v5299_v20  ;;  %v5384_v20 = vld [vmem:[#allocation6 + $0x368] ss:$24 sps:$4 sm:$0xff]  }
 0x140   : > { %2365 = vmatpush1.bf16.msra.mxu1 %v5300_v23  ;;  %v5395_v23 = vld [vmem:[#allocation6 + $0xa4] ss:$24 sps:$4 sm:$0xff]  }
 0x141   : > { %2322 = vmatpush1.bf16.msra.mxu0 %v5297_v22  ;;  %2366 = vmatprep.subr.bf16.mxu1 %v5308_v25  ;;  %v5392_v22 = vld [vmem:[#allocation6 + $0x39c] ss:$24 sps:$4 sm:$0xff]   ;;  %v5393_v25 = vld [vmem:[#allocation6 + $0xa0] ss:$24 sps:$4 sm:$0xff]  }
 0x142   : > { %2323 = vmatprep.subr.bf16.mxu0 %v5305_v24  ;;  %v5390_v24 = vld [vmem:[#allocation6 + $0x398] ss:$24 sps:$4 sm:$0xff]  }
 0x144   : > { %2367 = vmatpush1.bf16.msra.mxu1 %v5306_v27  ;;  %v5401_v27 = vld [vmem:[#allocation6 + $0xd4] ss:$24 sps:$4 sm:$0xff]  }
 0x145   : > { %2324 = vmatpush1.bf16.msra.mxu0 %v5303_v26  ;;  %2368 = vmatprep.subr.bf16.mxu1 %v5314_v29  ;;  %v5398_v26 = vld [vmem:[#allocation6 + $0x3cc] ss:$24 sps:$4 sm:$0xff]  }
 0x146   : > { %2325 = vmatprep.subr.bf16.mxu0 %v5311_v28  ;;  %v5396_v28 = vld [vmem:[#allocation6 + $0x3c8] ss:$24 sps:$4 sm:$0xff]   ;;  %v5407_v29 = vld [vmem:[#allocation6 + $0x104] ss:$24 sps:$4 sm:$0xff]  }
 0x148   : > { %2369 = vmatpush1.bf16.msra.mxu1 %v5312_v31  ;;  %v5405_v31 = vld [vmem:[#allocation6 + $0x100] ss:$24 sps:$4 sm:$0xff]  }
 0x149   : > { %2326 = vmatpush1.bf16.msra.mxu0 %v5309_v30  ;;  %2370 = vmatprep.subr.bf16.mxu1 %v5320_v33  ;;  %v5402_v30 = vld [vmem:[#allocation6 + $0x3f8] ss:$24 sps:$4 sm:$0xff]   ;;  %v5413_v33 = vld [vmem:[#allocation6 + $0x134] ss:$24 sps:$4 sm:$0xff]  }
 0x14a   : > { %2327 = vmatprep.subr.bf16.mxu0 %v5317_v32  ;;  %v5410_v32 = vld [vmem:[#allocation6 + $0x42c] ss:$24 sps:$4 sm:$0xff]  }
 0x14c   : > { %2371 = vmatpush1.bf16.msra.mxu1 %v5318_v36  ;;  %v5411_v36 = vld [vmem:[#allocation6 + $0x130] ss:$24 sps:$4 sm:$0xff]  }
 0x14d   : > { %2328 = vmatpush1.bf16.msra.mxu0 %v5315_v35  ;;  %2372 = vmatprep.subr.bf16.mxu1 %v5326_v38  ;;  %v5408_v35 = vld [vmem:[#allocation6 + $0x428] ss:$24 sps:$4 sm:$0xff]   ;;  %v5419_v38 = vld [vmem:[#allocation6 + $0x164] ss:$24 sps:$4 sm:$0xff]  }
 0x14e   : > { %2329 = vmatprep.subr.bf16.mxu0 %v5323_v37  ;;  %v5416_v37 = vld [vmem:[#allocation6 + $0x45c] ss:$24 sps:$4 sm:$0xff]  }
 0x150   : > { %2373 = vmatpush1.bf16.msra.mxu1 %v5324_v40  ;;  %v5417_v40 = vld [vmem:[#allocation6 + $0x160] ss:$24 sps:$4 sm:$0xff]  }
 0x151   : > { %2330 = vmatpush1.bf16.msra.mxu0 %v5321_v39  ;;  %2374 = vmatprep.subr.bf16.mxu1 %v5332_v42  ;;  %v5414_v39 = vld [vmem:[#allocation6 + $0x458] ss:$24 sps:$4 sm:$0xff]   ;;  %v5425_v42 = vld [vmem:[#allocation6 + $0x194] ss:$24 sps:$4 sm:$0xff]  }
 0x152   : > { %2331 = vmatprep.subr.bf16.mxu0 %v5329_v41  ;;  %v5422_v41 = vld [vmem:[#allocation6 + $0x48c] ss:$24 sps:$4 sm:$0xff]  }
 0x154   : > { %2375 = vmatpush1.bf16.msra.mxu1 %v5330_v44  ;;  %v5423_v44 = vld [vmem:[#allocation6 + $0x190] ss:$24 sps:$4 sm:$0xff]  }
 0x155   : > { %2332 = vmatpush1.bf16.msra.mxu0 %v5327_v43  ;;  %2376 = vmatprep.subr.bf16.mxu1 %v5338_v46  ;;  %v5420_v43 = vld [vmem:[#allocation6 + $0x488] ss:$24 sps:$4 sm:$0xff]   ;;  %v5431_v46 = vld [vmem:[#allocation6 + $0x1c4] ss:$24 sps:$4 sm:$0xff]  }
 0x156   : > { %2333 = vmatprep.subr.bf16.mxu0 %v5335_v45  ;;  %v5428_v45 = vld [vmem:[#allocation6 + $0x4bc] ss:$24 sps:$4 sm:$0xff]  }
 0x158   : > { %2377 = vmatpush1.bf16.msra.mxu1 %v5336_v50  ;;  %v5429_v50 = vld [vmem:[#allocation6 + $0x1c0] ss:$24 sps:$4 sm:$0xff]  }
 0x159   : > { %2334 = vmatpush1.bf16.msra.mxu0 %v5333_v47  ;;  %2378 = vmatprep.subr.bf16.mxu1 %v5344_v52  ;;  %v5426_v47 = vld [vmem:[#allocation6 + $0x4b8] ss:$24 sps:$4 sm:$0xff]   ;;  %v5437_v52 = vld [vmem:[#allocation6 + $0x1f4] ss:$24 sps:$4 sm:$0xff]  }
 0x15a   : > { %2335 = vmatprep.subr.bf16.mxu0 %v5341_v51  ;;  %v5434_v51 = vld [vmem:[#allocation6 + $0x4ec] ss:$24 sps:$4 sm:$0xff]  }
 0x15c   : > { %2379 = vmatpush1.bf16.msra.mxu1 %v5342_v54  ;;  %v5435_v54 = vld [vmem:[#allocation6 + $0x1f0] ss:$24 sps:$4 sm:$0xff]  }
 0x15d   : > { %2336 = vmatpush1.bf16.msra.mxu0 %v5339_v53  ;;  %2380 = vmatprep.subr.bf16.mxu1 %v5350_v56  ;;  %v5432_v53 = vld [vmem:[#allocation6 + $0x4e8] ss:$24 sps:$4 sm:$0xff]   ;;  %v5443_v56 = vld [vmem:[#allocation6 + $0x224] ss:$24 sps:$4 sm:$0xff]  }
 0x15e   : > { %2337 = vmatprep.subr.bf16.mxu0 %v5347_v55  ;;  %v5440_v55 = vld [vmem:[#allocation6 + $0x51c] ss:$24 sps:$4 sm:$0xff]  }
 0x160   : > { %2381 = vmatpush1.bf16.msra.mxu1 %v5348_v58  ;;  %v5441_v58 = vld [vmem:[#allocation6 + $0x220] ss:$24 sps:$4 sm:$0xff]  }
 0x161   : > { %2338 = vmatpush1.bf16.msra.mxu0 %v5345_v57  ;;  %2382 = vmatprep.subr.bf16.mxu1 %v5356_v60  ;;  %v5438_v57 = vld [vmem:[#allocation6 + $0x518] ss:$24 sps:$4 sm:$0xff]   ;;  %v5449_v60 = vld [vmem:[#allocation6 + $0x254] ss:$24 sps:$4 sm:$0xff]  }
 0x162   : > { %2339 = vmatprep.subr.bf16.mxu0 %v5353_v59  ;;  %v5446_v59 = vld [vmem:[#allocation6 + $0x54c] ss:$24 sps:$4 sm:$0xff]  }
 0x164   : > { %2383 = vmatpush1.bf16.msra.mxu1 %v5354_v62  ;;  %v5447_v62 = vld [vmem:[#allocation6 + $0x250] ss:$24 sps:$4 sm:$0xff]  }
 0x165   : > { %2340 = vmatpush1.bf16.msra.mxu0 %v5351_v61  ;;  %2384 = vmatprep.subr.bf16.mxu1 %v5362_v0  ;;  %v5444_v61 = vld [vmem:[#allocation6 + $0x548] ss:$24 sps:$4 sm:$0xff]   ;;  %v5455_v0 = vld [vmem:[#allocation6 + $0x284] ss:$24 sps:$4 sm:$0xff]  }
 0x166   : > { %2341 = vmatprep.subr.bf16.mxu0 %v5359_v63  ;;  %v5452_v63 = vld [vmem:[#allocation6 + $0x57c] ss:$24 sps:$4 sm:$0xff]  }
 0x168   : > { %2385 = vmatpush1.bf16.msra.mxu1 %v5360_v2  ;;  %v5453_v2 = vld [vmem:[#allocation6 + $0x280] ss:$24 sps:$4 sm:$0xff]  }
 0x169   : > { %2342 = vmatpush1.bf16.msra.mxu0 %v5357_v1  ;;  %2386 = vmatprep.subr.bf16.mxu1 %v5368_v4  ;;  %v5450_v1 = vld [vmem:[#allocation6 + $0x578] ss:$24 sps:$4 sm:$0xff]   ;;  %v5461_v4 = vld [vmem:[#allocation6 + $0x2b4] ss:$24 sps:$4 sm:$0xff]  }
 0x16a   : > { %2343 = vmatprep.subr.bf16.mxu0 %v5365_v3  ;;  %v5458_v3 = vld [vmem:[#allocation6 + $0x5ac] ss:$24 sps:$4 sm:$0xff]  }
 0x16c   : > { %2387 = vmatpush1.bf16.msra.mxu1 %v5366_v8  ;;  %v5459_v8 = vld [vmem:[#allocation6 + $0x2b0] ss:$24 sps:$4 sm:$0xff]  }
 0x16d   : > { %2344 = vmatpush1.bf16.msra.mxu0 %v5363_v5  ;;  %2399 = vmatprep.subr.bf16.mxu1 %v5374_v9  ;;  %v5456_v5 = vld [vmem:[#allocation6 + $0x5a8] ss:$24 sps:$4 sm:$0xff]   ;;  %v5464_v9 = vld [vmem:[#allocation6 + $0x5dc] ss:$24 sps:$4 sm:$0xff]  }
 0x16e   : > { %2485 = vmatprep.subr.bf16.mxu0 %v5377_v10  ;;  %v5467_v10 = vld [vmem:[#allocation6 + $0x2e4] ss:$24 sps:$4 sm:$0xff]  }
 0x16f   : > { %2389 = vmatmul.mubr.bf16.vlgmr.msra.gmra.mrb[4].mxu1 %v6583_v6 }
 0x170   : > { %2346 = vmatmul.mubr.bf16.vlgmr.msra.gmra.mrb[0].mxu0 %v6593_v11  ;;  %2400 = vmatpush1.bf16.msra.mxu1 %v5372_v12  ;;  %v5462_v12 = vld [vmem:[#allocation6 + $0x5d8] ss:$24 sps:$4 sm:$0xff]  }
 0x171   : > { %2486 = vmatpush1.bf16.msra.mxu0 %v5375_v13  ;;  %2401 = vmatprep.subr.bf16.mxu1 %v5380_v14  ;;  %v5465_v13 = vld [vmem:[#allocation6 + $0x2e0] ss:$24 sps:$4 sm:$0xff]   ;;  %v5470_v14 = vld [vmem:[#allocation6 + $0x60c] ss:$24 sps:$4 sm:$0xff]  }
 0x172   : > { %2487 = vmatprep.subr.bf16.mxu0 %v5383_v15  ;;  %2431 = vmatprep.mubr.bf16.mxu1 %v6579_v49  ;;  %v5399_v49 = vld [vmem:[#allocation6 + $0xd0] ss:$24 sps:$4 sm:$0xff]   ;;  %v5473_v15 = vld [vmem:[#allocation6 + $0x314] ss:$24 sps:$4 sm:$0xff]  }
 0x173   : > { %2517 = vmatprep.mubr.bf16.mxu0 %v6577_v48  ;;  %v5404_v48 = vld [vmem:[#allocation6 + $0x3fc] ss:$24 sps:$4 sm:$0xff]  }
 0x174   : > { %2402 = vmatpush1.bf16.msra.mxu1 %v5378_v16  ;;  %v5468_v16 = vld [vmem:[#allocation6 + $0x608] ss:$24 sps:$4 sm:$0xff]  }
 0x175   : > { %2488 = vmatpush1.bf16.msra.mxu0 %v5381_v17  ;;  %2403 = vmatprep.subr.bf16.mxu1 %v5386_v18  ;;  %v5471_v17 = vld [vmem:[#allocation6 + $0x310] ss:$24 sps:$4 sm:$0xff]   ;;  %v5476_v18 = vld [vmem:[#allocation6 + $0x63c] ss:$24 sps:$4 sm:$0xff]  }
 0x176   : > { %2489 = vmatprep.subr.bf16.mxu0 %v5389_v19  ;;  %v5479_v19 = vld [vmem:[#allocation6 + $0x344] ss:$24 sps:$4 sm:$0xff]  }
 0x178   : > { %2404 = vmatpush1.bf16.msra.mxu1 %v5384_v20  ;;  %v5474_v20 = vld [vmem:[#allocation6 + $0x638] ss:$24 sps:$4 sm:$0xff]  }
 0x179   : > { %2490 = vmatpush1.bf16.msra.mxu0 %v5387_v21  ;;  %2405 = vmatprep.subr.bf16.mxu1 %v5392_v22  ;;  %v5477_v21 = vld [vmem:[#allocation6 + $0x340] ss:$24 sps:$4 sm:$0xff]   ;;  %v5482_v22 = vld [vmem:[#allocation6 + $0x66c] ss:$24 sps:$4 sm:$0xff]  }
 0x17a   : > { %2491 = vmatprep.subr.bf16.mxu0 %v5395_v23  ;;  %v5485_v23 = vld [vmem:[#allocation6 + $0x374] ss:$24 sps:$4 sm:$0xff]  }
 0x17c   : > { %2406 = vmatpush1.bf16.msra.mxu1 %v5390_v24  ;;  %v5640_v24 = vld [vmem:[#allocation3 + $0xc] ss:$24 sps:$4 sm:$0xff]  }
 0x17d   : > { %2492 = vmatpush1.bf16.msra.mxu0 %v5393_v25  ;;  %2407 = vmatprep.subr.bf16.mxu1 %v5398_v26  ;;  %v5480_v25 = vld [vmem:[#allocation6 + $0x668] ss:$24 sps:$4 sm:$0xff]  }
 0x17e   : > { %2493 = vmatprep.subr.bf16.mxu0 %v5401_v27  ;;  %v5483_v26 = vld [vmem:[#allocation6 + $0x370] ss:$24 sps:$4 sm:$0xff]  }
 0x17f   : > { %v5486_v27 = vld [vmem:[#allocation6 + $0x698] ss:$24 sps:$4 sm:$0xff]  }
 0x180   : > { %2408 = vmatpush1.bf16.msra.mxu1 %v5396_v28  ;;  %v5489_v28 = vld [vmem:[#allocation6 + $0x3a0] ss:$24 sps:$4 sm:$0xff]  }
 0x181   : > { %2494 = vmatpush1.bf16.msra.mxu0 %v5399_v49  ;;  %2409 = vmatprep.subr.bf16.mxu1 %v5404_v48  ;;  %v5494_v49 = vld [vmem:[#allocation6 + $0x6cc] ss:$24 sps:$4 sm:$0xff]  }
 0x182   : > { %2495 = vmatprep.subr.bf16.mxu0 %v5407_v29  ;;  %v5497_v48 = vld [vmem:[#allocation6 + $0x3d4] ss:$24 sps:$4 sm:$0xff]   ;;  %v5492_v29 = vld [vmem:[#allocation6 + $0x6c8] ss:$24 sps:$4 sm:$0xff]  }
 0x184   : > { %2410 = vmatpush1.bf16.msra.mxu1 %v5402_v30  ;;  %v5495_v30 = vld [vmem:[#allocation6 + $0x3d0] ss:$24 sps:$4 sm:$0xff]  }
 0x185   : > { %2496 = vmatpush1.bf16.msra.mxu0 %v5405_v31  ;;  %2411 = vmatprep.subr.bf16.mxu1 %v5410_v32  ;;  %v5500_v31 = vld [vmem:[#allocation6 + $0x6fc] ss:$24 sps:$4 sm:$0xff]  }
 0x186   : > { %2497 = vmatprep.subr.bf16.mxu0 %v5413_v33  ;;  %v5503_v32 = vld [vmem:[#allocation6 + $0x404] ss:$24 sps:$4 sm:$0xff]   ;;  %v5498_v33 = vld [vmem:[#allocation6 + $0x6f8] ss:$24 sps:$4 sm:$0xff]  }
 0x188   : > { %2412 = vmatpush1.bf16.msra.mxu1 %v5408_v35  ;;  %v5501_v35 = vld [vmem:[#allocation6 + $0x400] ss:$24 sps:$4 sm:$0xff]  }
 0x189   : > { %2498 = vmatpush1.bf16.msra.mxu0 %v5411_v36  ;;  %2413 = vmatprep.subr.bf16.mxu1 %v5416_v37  ;;  %v5506_v36 = vld [vmem:[#allocation6 + $0x72c] ss:$24 sps:$4 sm:$0xff]  }
 0x18a   : > { %2499 = vmatprep.subr.bf16.mxu0 %v5419_v38  ;;  %v5509_v37 = vld [vmem:[#allocation6 + $0x434] ss:$24 sps:$4 sm:$0xff]   ;;  %v5504_v38 = vld [vmem:[#allocation6 + $0x728] ss:$24 sps:$4 sm:$0xff]  }
 0x18c   : > { %2414 = vmatpush1.bf16.msra.mxu1 %v5414_v39  ;;  %v5507_v39 = vld [vmem:[#allocation6 + $0x430] ss:$24 sps:$4 sm:$0xff]  }
 0x18d   : > { %2500 = vmatpush1.bf16.msra.mxu0 %v5417_v40  ;;  %2415 = vmatprep.subr.bf16.mxu1 %v5422_v41  ;;  %v5512_v40 = vld [vmem:[#allocation6 + $0x75c] ss:$24 sps:$4 sm:$0xff]  }
 0x18e   : > { %2501 = vmatprep.subr.bf16.mxu0 %v5425_v42  ;;  %v5515_v41 = vld [vmem:[#allocation6 + $0x464] ss:$24 sps:$4 sm:$0xff]   ;;  %v5510_v42 = vld [vmem:[#allocation6 + $0x758] ss:$24 sps:$4 sm:$0xff]  }
 0x190   : > { %2416 = vmatpush1.bf16.msra.mxu1 %v5420_v43  ;;  %v5513_v43 = vld [vmem:[#allocation6 + $0x460] ss:$24 sps:$4 sm:$0xff]  }
 0x191   : > { %2502 = vmatpush1.bf16.msra.mxu0 %v5423_v44  ;;  %2417 = vmatprep.subr.bf16.mxu1 %v5428_v45  ;;  %v5518_v44 = vld [vmem:[#allocation6 + $0x78c] ss:$24 sps:$4 sm:$0xff]  }
 0x192   : > { %2503 = vmatprep.subr.bf16.mxu0 %v5431_v46  ;;  %v5521_v45 = vld [vmem:[#allocation6 + $0x494] ss:$24 sps:$4 sm:$0xff]   ;;  %v5516_v46 = vld [vmem:[#allocation6 + $0x788] ss:$24 sps:$4 sm:$0xff]  }
 0x194   : > { %2418 = vmatpush1.bf16.msra.mxu1 %v5426_v47  ;;  %v5519_v47 = vld [vmem:[#allocation6 + $0x490] ss:$24 sps:$4 sm:$0xff]  }
 0x195   : > { %2504 = vmatpush1.bf16.msra.mxu0 %v5429_v50  ;;  %2419 = vmatprep.subr.bf16.mxu1 %v5434_v51  ;;  %v5524_v50 = vld [vmem:[#allocation6 + $0x7bc] ss:$24 sps:$4 sm:$0xff]  }
 0x196   : > { %2505 = vmatprep.subr.bf16.mxu0 %v5437_v52  ;;  %v5527_v51 = vld [vmem:[#allocation6 + $0x4c4] ss:$24 sps:$4 sm:$0xff]   ;;  %v5522_v52 = vld [vmem:[#allocation6 + $0x7b8] ss:$24 sps:$4 sm:$0xff]  }
 0x198   : > { %2420 = vmatpush1.bf16.msra.mxu1 %v5432_v53  ;;  %v5525_v53 = vld [vmem:[#allocation6 + $0x4c0] ss:$24 sps:$4 sm:$0xff]  }
 0x199   : > { %2506 = vmatpush1.bf16.msra.mxu0 %v5435_v54  ;;  %2421 = vmatprep.subr.bf16.mxu1 %v5440_v55  ;;  %v5530_v54 = vld [vmem:[#allocation6 + $0x7ec] ss:$24 sps:$4 sm:$0xff]  }
 0x19a   : > { %2507 = vmatprep.subr.bf16.mxu0 %v5443_v56  ;;  %v5533_v55 = vld [vmem:[#allocation6 + $0x4f4] ss:$24 sps:$4 sm:$0xff]   ;;  %v5528_v56 = vld [vmem:[#allocation6 + $0x7e8] ss:$24 sps:$4 sm:$0xff]  }
 0x19c   : > { %2422 = vmatpush1.bf16.msra.mxu1 %v5438_v57  ;;  %v5531_v57 = vld [vmem:[#allocation6 + $0x4f0] ss:$24 sps:$4 sm:$0xff]  }
 0x19d   : > { %2508 = vmatpush1.bf16.msra.mxu0 %v5441_v58  ;;  %2423 = vmatprep.subr.bf16.mxu1 %v5446_v59  ;;  %v5536_v58 = vld [vmem:[#allocation6 + $0x81c] ss:$24 sps:$4 sm:$0xff]  }
 0x19e   : > { %2509 = vmatprep.subr.bf16.mxu0 %v5449_v60  ;;  %v5539_v59 = vld [vmem:[#allocation6 + $0x524] ss:$24 sps:$4 sm:$0xff]   ;;  %v5534_v60 = vld [vmem:[#allocation6 + $0x818] ss:$24 sps:$4 sm:$0xff]  }
 0x1a0   : > { %2424 = vmatpush1.bf16.msra.mxu1 %v5444_v61  ;;  %v5537_v61 = vld [vmem:[#allocation6 + $0x520] ss:$24 sps:$4 sm:$0xff]  }
 0x1a1   : > { %2510 = vmatpush1.bf16.msra.mxu0 %v5447_v62  ;;  %2425 = vmatprep.subr.bf16.mxu1 %v5452_v63  ;;  %v5542_v62 = vld [vmem:[#allocation6 + $0x84c] ss:$24 sps:$4 sm:$0xff]  }
 0x1a2   : > { %2511 = vmatprep.subr.bf16.mxu0 %v5455_v0  ;;  %v5545_v63 = vld [vmem:[#allocation6 + $0x554] ss:$24 sps:$4 sm:$0xff]   ;;  %v5540_v0 = vld [vmem:[#allocation6 + $0x848] ss:$24 sps:$4 sm:$0xff]  }
 0x1a4   : > { %2426 = vmatpush1.bf16.msra.mxu1 %v5450_v1  ;;  %v5543_v1 = vld [vmem:[#allocation6 + $0x550] ss:$24 sps:$4 sm:$0xff]  }
 0x1a5   : > { %2512 = vmatpush1.bf16.msra.mxu0 %v5453_v2  ;;  %2427 = vmatprep.subr.bf16.mxu1 %v5458_v3  ;;  %v5548_v2 = vld [vmem:[#allocation6 + $0x87c] ss:$24 sps:$4 sm:$0xff]  }
 0x1a6   : > { %2513 = vmatprep.subr.bf16.mxu0 %v5461_v4  ;;  %v5551_v3 = vld [vmem:[#allocation6 + $0x584] ss:$24 sps:$4 sm:$0xff]   ;;  %v5546_v4 = vld [vmem:[#allocation6 + $0x878] ss:$24 sps:$4 sm:$0xff]  }
 0x1a8   : > { %2428 = vmatpush1.bf16.msra.mxu1 %v5456_v5  ;;  %v5549_v5 = vld [vmem:[#allocation6 + $0x580] ss:$24 sps:$4 sm:$0xff]  }
 0x1a9   : > { %2514 = vmatpush1.bf16.msra.mxu0 %v5459_v8  ;;  %2429 = vmatprep.subr.bf16.mxu1 %v5464_v9  ;;  %v5554_v8 = vld [vmem:[#allocation6 + $0x8ac] ss:$24 sps:$4 sm:$0xff]  }
 0x1aa   : > { %2515 = vmatprep.subr.bf16.mxu0 %v5467_v10  ;;  %v5557_v9 = vld [vmem:[#allocation6 + $0x5b4] ss:$24 sps:$4 sm:$0xff]   ;;  %v5552_v10 = vld [vmem:[#allocation6 + $0x8a8] ss:$24 sps:$4 sm:$0xff]  }
 0x1ac   : > { %2430 = vmatpush1.bf16.msra.mxu1 %v5462_v12  ;;  %v5555_v12 = vld [vmem:[#allocation6 + $0x5b0] ss:$24 sps:$4 sm:$0xff]  }
 0x1ad   : > { %2516 = vmatpush1.bf16.msra.mxu0 %v5465_v13  ;;  %2442 = vmatprep.subr.bf16.mxu1 %v5470_v14  ;;  %v5560_v13 = vld [vmem:[#allocation6 + $0x8dc] ss:$24 sps:$4 sm:$0xff]  }
 0x1ae   : > { %2528 = vmatprep.subr.bf16.mxu0 %v5473_v15  ;;  %v5563_v14 = vld [vmem:[#allocation6 + $0x5e4] ss:$24 sps:$4 sm:$0xff]   ;;  %v5558_v15 = vld [vmem:[#allocation6 + $0x8d8] ss:$24 sps:$4 sm:$0xff]  }
 0x1af   : > { %2432 = vmatmul.mubr.bf16.vlgmr.msra.gmra.mrb[4].mxu1 %v6585_v7  ;;  %v5488_v7 = vld [vmem:[#allocation6 + $0x69c] ss:$24 sps:$4 sm:$0xff]  }
 0x1b0   : > { %2518 = vmatmul.mubr.bf16.vlgmr.msra.gmra.mrb[4].mxu0 %v6583_v6  ;;  %2443 = vmatpush1.bf16.msra.mxu1 %v5468_v16  ;;  %v5491_v6 = vld [vmem:[#allocation6 + $0x3a4] ss:$24 sps:$4 sm:$0xff]   ;;  %v5561_v16 = vld [vmem:[#allocation6 + $0x5e0] ss:$24 sps:$4 sm:$0xff]  }
 0x1b1   : > { %2529 = vmatpush1.bf16.msra.mxu0 %v5471_v17  ;;  %2444 = vmatprep.subr.bf16.mxu1 %v5476_v18  ;;  %v5566_v17 = vld [vmem:[#allocation6 + $0x614] ss:$24 sps:$4 sm:$0xff]   ;;  %v5564_v18 = vld [vmem:[#allocation6 + $0x610] ss:$24 sps:$4 sm:$0xff]  }
 0x1b2   : > { %2530 = vmatprep.subr.bf16.mxu0 %v5479_v19  ;;  %2474 = vmatprep.mubr.bf16.mxu1 %v6590_v34  ;;  %v5569_v19 = vld [vmem:[#allocation6 + $0x644] ss:$24 sps:$4 sm:$0xff]  }
 0x1b3   : > { %2560 = vmatprep.mubr.bf16.mxu0 %v5640_v24  ;;  %v5575_v24 = vld [vmem:[#allocation6 + $0x6a4] ss:$24 sps:$4 sm:$0xff]  }
 0x1b4   : > { %2445 = vmatpush1.bf16.msra.mxu1 %v5474_v20  ;;  %v5641_v20 = vld [vmem:[#allocation3 + $0x8] ss:$24 sps:$4 sm:$0xff]  }
 0x1b5   : > { %2531 = vmatpush1.bf16.msra.mxu0 %v5477_v21  ;;  %2446 = vmatprep.subr.bf16.mxu1 %v5482_v22  ;;  %v5567_v21 = vld [vmem:[#allocation6 + $0x640] ss:$24 sps:$4 sm:$0xff]   ;;  %v5572_v22 = vld [vmem:[#allocation6 + $0x674] ss:$24 sps:$4 sm:$0xff]  }
 0x1b6   : > { %2532 = vmatprep.subr.bf16.mxu0 %v5485_v23  ;;  %v5570_v23 = vld [vmem:[#allocation6 + $0x670] ss:$24 sps:$4 sm:$0xff]  }
 0x1b8   : > { %2447 = vmatpush1.bf16.msra.mxu1 %v5480_v25  ;;  %v5573_v25 = vld [vmem:[#allocation6 + $0x6a0] ss:$24 sps:$4 sm:$0xff]  }
 0x1b9   : > { %2533 = vmatpush1.bf16.msra.mxu0 %v5483_v26  ;;  %2448 = vmatprep.subr.bf16.mxu1 %v5488_v7  ;;  %v5578_v26 = vld [vmem:[#allocation6 + $0x6d4] ss:$24 sps:$4 sm:$0xff]   ;;  %v5576_v7 = vld [vmem:[#allocation6 + $0x6d0] ss:$24 sps:$4 sm:$0xff]  }
 0x1ba   : > { %2534 = vmatprep.subr.bf16.mxu0 %v5491_v6  ;;  %v5581_v6 = vld [vmem:[#allocation6 + $0x704] ss:$24 sps:$4 sm:$0xff]  }
 0x1bc   : > { %2449 = vmatpush1.bf16.msra.mxu1 %v5486_v27  ;;  %v5579_v27 = vld [vmem:[#allocation6 + $0x700] ss:$24 sps:$4 sm:$0xff]  }
 0x1bd   : > { %2535 = vmatpush1.bf16.msra.mxu0 %v5489_v28  ;;  %2450 = vmatprep.subr.bf16.mxu1 %v5494_v49  ;;  %v5584_v28 = vld [vmem:[#allocation6 + $0x734] ss:$24 sps:$4 sm:$0xff]  }
 0x1be   : > { %2536 = vmatprep.subr.bf16.mxu0 %v5497_v48  ;;  %v5582_v48 = vld [vmem:[#allocation6 + $0x730] ss:$24 sps:$4 sm:$0xff]  }
 0x1c0   : > { %2451 = vmatpush1.bf16.msra.mxu1 %v5492_v29 }
 0x1c1   : > { %2537 = vmatpush1.bf16.msra.mxu0 %v5495_v30  ;;  %2452 = vmatprep.subr.bf16.mxu1 %v5500_v31  ;;  %v5587_v30 = vld [vmem:[#allocation6 + $0x764] ss:$24 sps:$4 sm:$0xff]  }
 0x1c2   : > { %2538 = vmatprep.subr.bf16.mxu0 %v5503_v32  ;;  %v5585_v32 = vld [vmem:[#allocation6 + $0x760] ss:$24 sps:$4 sm:$0xff]  }
 0x1c4   : > { %2453 = vmatpush1.bf16.msra.mxu1 %v5498_v33  ;;  %v5590_v33 = vld [vmem:[#allocation6 + $0x794] ss:$24 sps:$4 sm:$0xff]  }
 0x1c5   : > { %2539 = vmatpush1.bf16.msra.mxu0 %v5501_v35  ;;  %2454 = vmatprep.subr.bf16.mxu1 %v5506_v36  ;;  %v5588_v35 = vld [vmem:[#allocation6 + $0x790] ss:$24 sps:$4 sm:$0xff]   ;;  %v5593_v36 = vld [vmem:[#allocation6 + $0x7c4] ss:$24 sps:$4 sm:$0xff]  }
 0x1c6   : > { %2540 = vmatprep.subr.bf16.mxu0 %v5509_v37  ;;  %v5591_v37 = vld [vmem:[#allocation6 + $0x7c0] ss:$24 sps:$4 sm:$0xff]  }
 0x1c8   : > { %2455 = vmatpush1.bf16.msra.mxu1 %v5504_v38  ;;  %v5596_v38 = vld [vmem:[#allocation6 + $0x7f4] ss:$24 sps:$4 sm:$0xff]  }
 0x1c9   : > { %2541 = vmatpush1.bf16.msra.mxu0 %v5507_v39  ;;  %2456 = vmatprep.subr.bf16.mxu1 %v5512_v40  ;;  %v5594_v39 = vld [vmem:[#allocation6 + $0x7f0] ss:$24 sps:$4 sm:$0xff]   ;;  %v5599_v40 = vld [vmem:[#allocation6 + $0x824] ss:$24 sps:$4 sm:$0xff]  }
 0x1ca   : > { %2542 = vmatprep.subr.bf16.mxu0 %v5515_v41  ;;  %v5597_v41 = vld [vmem:[#allocation6 + $0x820] ss:$24 sps:$4 sm:$0xff]  }
 0x1cc   : > { %2457 = vmatpush1.bf16.msra.mxu1 %v5510_v42  ;;  %v5602_v42 = vld [vmem:[#allocation6 + $0x854] ss:$24 sps:$4 sm:$0xff]  }
 0x1cd   : > { %2543 = vmatpush1.bf16.msra.mxu0 %v5513_v43  ;;  %2458 = vmatprep.subr.bf16.mxu1 %v5518_v44  ;;  %v5600_v43 = vld [vmem:[#allocation6 + $0x850] ss:$24 sps:$4 sm:$0xff]   ;;  %v5605_v44 = vld [vmem:[#allocation6 + $0x884] ss:$24 sps:$4 sm:$0xff]  }
 0x1ce   : > { %2544 = vmatprep.subr.bf16.mxu0 %v5521_v45  ;;  %v5603_v45 = vld [vmem:[#allocation6 + $0x880] ss:$24 sps:$4 sm:$0xff]  }
 0x1d0   : > { %2459 = vmatpush1.bf16.msra.mxu1 %v5516_v46  ;;  %v5608_v46 = vld [vmem:[#allocation6 + $0x8b4] ss:$24 sps:$4 sm:$0xff]  }
 0x1d1   : > { %2545 = vmatpush1.bf16.msra.mxu0 %v5519_v47  ;;  %2460 = vmatprep.subr.bf16.mxu1 %v5524_v50  ;;  %v5606_v47 = vld [vmem:[#allocation6 + $0x8b0] ss:$24 sps:$4 sm:$0xff]   ;;  %v5611_v50 = vld [vmem:[#allocation6 + $0x8e4] ss:$24 sps:$4 sm:$0xff]  }
 0x1d2   : > { %2546 = vmatprep.subr.bf16.mxu0 %v5527_v51  ;;  %v5609_v51 = vld [vmem:[#allocation6 + $0x8e0] ss:$24 sps:$4 sm:$0xff]  }
 0x1d4   : > { %2461 = vmatpush1.bf16.msra.mxu1 %v5522_v52  ;;  %v727_v52 = vlaneseq }
 0x1d5   : > { %2547 = vmatpush1.bf16.msra.mxu0 %v5525_v53  ;;  %2462 = vmatprep.subr.bf16.mxu1 %v5530_v54 }
 0x1d6   : > { %2548 = vmatprep.subr.bf16.mxu0 %v5533_v55  ;;  %v728_v53 = vshrl.u32 %v727_v52, 7  ;;  %v725_v55 = vld [vmem:[#allocation8] sm:$0x3f] }
 0x1d8   : > { %2463 = vmatpush1.bf16.msra.mxu1 %v5528_v56  ;;  %v6605_v54 = vsub.s32 0, %v728_v53  ;;  %v6607_v56 = vsub.s32 1, %v728_v53 }
 0x1d9   : > { %2549 = vmatpush1.bf16.msra.mxu0 %v5531_v57  ;;  %2464 = vmatprep.subr.bf16.mxu1 %v5536_v58 }
 0x1da   : > { %2550 = vmatprep.subr.bf16.mxu0 %v5539_v59  ;;  %v730_v57 = vrot.slane %v725_v55, %v6605_v54  ;;  %v734_v58 = vrot.slane %v725_v55, %v6607_v56 }
 0x1dc   : > { %2465 = vmatpush1.bf16.msra.mxu1 %v5534_v60 }
 0x1dd   : > { %2551 = vmatpush1.bf16.msra.mxu0 %v5537_v61  ;;  %2466 = vmatprep.subr.bf16.mxu1 %v5542_v62 }
 0x1de   : > { %2552 = vmatprep.subr.bf16.mxu0 %v5545_v63 }
 0x1e0   : > { %2467 = vmatpush1.bf16.msra.mxu1 %v5540_v0 }
 0x1e1   : > { %2553 = vmatpush1.bf16.msra.mxu0 %v5543_v1  ;;  %2468 = vmatprep.subr.bf16.mxu1 %v5548_v2 }
 0x1e2   : > { %2554 = vmatprep.subr.bf16.mxu0 %v5551_v3 }
 0x1e4   : > { %2469 = vmatpush1.bf16.msra.mxu1 %v5546_v4 }
 0x1e5   : > { %2555 = vmatpush1.bf16.msra.mxu0 %v5549_v5  ;;  %2470 = vmatprep.subr.bf16.mxu1 %v5554_v8 }
 0x1e6   : > { %2556 = vmatprep.subr.bf16.mxu0 %v5557_v9 }
 0x1e8   : > { %2471 = vmatpush1.bf16.msra.mxu1 %v5552_v10 }
 0x1e9   : > { %2557 = vmatpush1.bf16.msra.mxu0 %v5555_v12  ;;  %2472 = vmatprep.subr.bf16.mxu1 %v5560_v13  ;;  %v6613_v13 = vsub.s32 2, %v728_v53 }
 0x1ea   : > { %2558 = vmatprep.subr.bf16.mxu0 %v5563_v14 }
 0x1eb   : > { %v738_v14 = vrot.slane %v725_v55, %v6613_v13 }
 0x1ec   : > { %2473 = vmatpush1.bf16.msra.mxu1 %v5558_v15  ;;  %v6616_v15 = vsub.s32 3, %v728_v53 }
 0x1ed   : > { %2559 = vmatpush1.bf16.msra.mxu0 %v5561_v16 }
 0x1ee   : > { %2571 = vmatprep.subr.bf16.mxu0 %v5566_v17 }
 0x1ef   : > { %2475 = vmatmul.mubr.bf16.vlgmr.msra.gmra.mrb[4].mxu1 %v6593_v11 }
 0x1f0   : > { %2561 = vmatmul.mubr.bf16.vlgmr.msra.gmra.mrb[4].mxu0 %v5641_v20 }
 0x1f1   : > { %2572 = vmatpush1.bf16.msra.mxu0 %v5564_v18  ;;  %2603 = vmatprep.mubr.bf16.mxu0 %v6590_v34  ;;  %v742_v18 = vrot.slane %v725_v55, %v6616_v15 }
 0x1f2   : > { %2573 = vmatprep.subr.bf16.mxu0 %v5569_v19 }
 0x1f5   : > { %2574 = vmatpush1.bf16.msra.mxu0 %v5567_v21 }
 0x1f6   : > { %2575 = vmatprep.subr.bf16.mxu0 %v5572_v22 }
 0x1f9   : > { %2576 = vmatpush1.bf16.msra.mxu0 %v5570_v23 }
 0x1fa   : > { %2577 = vmatprep.subr.bf16.mxu0 %v5575_v24 }
 0x1fd   : > { %2578 = vmatpush1.bf16.msra.mxu0 %v5573_v25 }
 0x1fe   : > { %2579 = vmatprep.subr.bf16.mxu0 %v5578_v26 }
 0x201   : > { %2580 = vmatpush1.bf16.msra.mxu0 %v5576_v7 }
 0x202   : > { %2581 = vmatprep.subr.bf16.mxu0 %v5581_v6  ;;  %v2261_v49 = vpop.f32.mrb[0].mxu1  ;;  %v6620_v6 = vsub.s32 4, %v728_v53 }
 0x203   : > { %v2263_v34 = vpop.f32.mrb[1].mxu1  ;;  %v2262_v59 = vadd.f32 %v2261_v49, %v730_v57 }
 0x204   : > { %v2265_v29 = vpop.f32.mrb[2].mxu1  ;;  %v2264_v60 = vadd.f32 %v2263_v34, %v734_v58  ;;  %v746_v49 = vrot.slane %v725_v55, %v6620_v6 }
 0x205   : > { %2582 = vmatpush1.bf16.msra.mxu0 %v5579_v27  ;;  %v2267_v31 = vpop.f32.mrb[3].mxu1  ;;  %v2266_v62 = vadd.f32 %v2265_v29, %v730_v57  ;;  %v6622_v27 = vsub.s32 5, %v728_v53 }
 0x206   : > { %2583 = vmatprep.subr.bf16.mxu0 %v5584_v28  ;;  %v2268_v1 = vadd.f32 %v2267_v31, %v734_v58 }
 0x207   : > { %v750_v34 = vrot.slane %v725_v55, %v6622_v27 }
 0x209   : > { %2584 = vmatpush1.bf16.msra.mxu0 %v5582_v48 }
 0x20a   : > { %2585 = vmatprep.subr.bf16.mxu0 %v5587_v30 }
 0x20d   : > { %2586 = vmatpush1.bf16.msra.mxu0 %v5585_v32 }
 0x20e   : > { %2587 = vmatprep.subr.bf16.mxu0 %v5590_v33 }
 0x211   : > { %2588 = vmatpush1.bf16.msra.mxu0 %v5588_v35 }
 0x212   : > { %2589 = vmatprep.subr.bf16.mxu0 %v5593_v36 }
 0x215   : > { %2590 = vmatpush1.bf16.msra.mxu0 %v5591_v37 }
 0x216   : > { %2591 = vmatprep.subr.bf16.mxu0 %v5596_v38 }
 0x219   : > { %2592 = vmatpush1.bf16.msra.mxu0 %v5594_v39 }
 0x21a   : > { %2593 = vmatprep.subr.bf16.mxu0 %v5599_v40 }
 0x21d   : > { %2594 = vmatpush1.bf16.msra.mxu0 %v5597_v41 }
 0x21e   : > { %2595 = vmatprep.subr.bf16.mxu0 %v5602_v42 }
 0x221   : > { %2596 = vmatpush1.bf16.msra.mxu0 %v5600_v43 }
 0x222   : > { %2597 = vmatprep.subr.bf16.mxu0 %v5605_v44 }
 0x225   : > { %2598 = vmatpush1.bf16.msra.mxu0 %v5603_v45 }
 0x226   : > { %2599 = vmatprep.subr.bf16.mxu0 %v5608_v46 }
 0x229   : > { %2600 = vmatpush1.bf16.msra.mxu0 %v5606_v47 }
 0x22a   : > { %2601 = vmatprep.subr.bf16.mxu0 %v5611_v50 }
 0x22d   : > { %2602 = vmatpush1.bf16.msra.mxu0 %v5609_v51 }
 0x230   : > { %2604 = vmatmul.mubr.bf16.vlgmr.msra.gmra.mrb[4].mxu0 %v6593_v11 }
 0x243   : > { %v2347_v61 = vpop.f32.mrb[0].mxu0 }
 0x244   : > { %v4984_v63 = vadd.f32 %v2347_v61, %v2262_v59  ;;  %v2349_v0 = vpop.f32.mrb[1].mxu0 }
 0x245   : > { %v4986_v2 = vadd.f32 %v2349_v0, %v2264_v60  ;;  %v2351_v11 = vpop.f32.mrb[2].mxu0 }
 0x246   : > { %v6611_v3 = vadd.f32 %v2351_v11, %v2266_v62  ;;  %v2353_v4 = vpop.f32.mrb[3].mxu0  ;;  %v2626_v16 = vmul.f32 0.70710677, %v4984_v63  ;;  %v2614_v43 = vmul.f32 0.5, %v4984_v63 }
 0x247   : > { %v4990_v5 = vadd.f32 %v2353_v4, %v2268_v1  ;;  %v2627_v19 = vmul.f32 0.70710677, %v4986_v2  ;;  %v2615_v50 = vmul.f32 0.5, %v4986_v2 }
 0x248   : > { %v2632_v20 = vmul.f32 0.70710677, %v6611_v3  ;;  %5612 = verf.f32 %v2626_v16  ;;  %v2620_v60 = vmul.f32 0.5, %v6611_v3 }
 0x249   : > { %v2633_v22 = vmul.f32 0.70710677, %v4990_v5  ;;  %5614 = verf.f32 %v2627_v19  ;;  %v2621_v61 = vmul.f32 0.5, %v4990_v5 }
 0x24a   : > { %5616 = verf.f32 %v2632_v20 }
 0x24b   : > { %5618 = verf.f32 %v2633_v22 }
 0x252   : > { %v5613_v48 = vpop.eup %5612 }
 0x253   : > { %v5615_v29 = vpop.eup %5614  ;;  %v2650_v39 = vadd.f32 1.0, %v5613_v48 }
 0x254   : > { %v5617_v31 = vpop.eup %5616  ;;  %v2651_v44 = vadd.f32 1.0, %v5615_v29 }
 0x255   : > { %v5619_v35 = vpop.eup %5618  ;;  %v2656_v51 = vadd.f32 1.0, %v5617_v31  ;;  %v2662_v59 = vmul.f32 %v2650_v39, %v2614_v43 }
 0x256   : > { %v2657_v53 = vadd.f32 1.0, %v5619_v35  ;;  %v2663_v62 = vmul.f32 %v2651_v44, %v2615_v50 }
 0x257   : > { %v2668_v11 = vmul.f32 %v2656_v51, %v2620_v60 }
 0x258   : > { %v2669_v2 = vmul.f32 %v2657_v53, %v2621_v61 }
 0x2c2   : > { %v2476_v8 = vpop.f32.mrb[4].mxu1 }
 0x2c3   : > { %v2478_v9 = vpop.f32.mrb[5].mxu1  ;;  %v4991_v17 = vadd.f32 %v2476_v8, %v738_v14 }
 0x2c4   : > { %v2480_v10 = vpop.f32.mrb[6].mxu1  ;;  %v4992_v24 = vadd.f32 %v2478_v9, %v742_v18 }
 0x2c5   : > { %v2482_v12 = vpop.f32.mrb[7].mxu1  ;;  %v4993_v21 = vadd.f32 %v2480_v10, %v738_v14  ;;  %v2628_v23 = vmul.f32 0.70710677, %v4991_v17  ;;  %v2616_v63 = vmul.f32 0.5, %v4991_v17  ;;  %v2674_v10 = vadd.f32 %v2663_v62, %v2662_v59 }
 0x2c6   : > { %v4994_v26 = vadd.f32 %v2482_v12, %v742_v18  ;;  %v2629_v7 = vmul.f32 0.70710677, %v4992_v24  ;;  %v2617_v12 = vmul.f32 0.5, %v4992_v24  ;;  %v2681_v18 = vadd.f32 %v2669_v2, %v2668_v11 }
 0x2c7   : > { %v2634_v25 = vmul.f32 0.70710677, %v4993_v21  ;;  %5620 = verf.f32 %v2628_v23  ;;  %v2622_v9 = vmul.f32 0.5, %v4993_v21 }
 0x2c8   : > { %v2635_v28 = vmul.f32 0.70710677, %v4994_v26  ;;  %v2623_v20 = vmul.f32 0.5, %v4994_v26 }
 0x2c9   : > { %5622 = verf.f32 %v2634_v25 }
 0x2ca   : > { %5624 = verf.f32 %v2629_v7 }
 0x2cb   : > { %5626 = verf.f32 %v2635_v28 }
 0x2d1   : > { %v5621_v38 = vpop.eup %5620 }
 0x2d2   : > { %v2652_v55 = vadd.f32 1.0, %v5621_v38 }
 0x2d3   : > { %v5623_v47 = vpop.eup %5622 }
 0x2d4   : > { %v5625_v58 = vpop.eup %5624  ;;  %v2658_v0 = vadd.f32 1.0, %v5623_v47  ;;  %v2664_v4 = vmul.f32 %v2652_v55, %v2616_v63 }
 0x2d5   : > { %v5627_v1 = vpop.eup %5626  ;;  %v2653_v8 = vadd.f32 1.0, %v5625_v58 }
 0x2d6   : > { %v2670_v14 = vmul.f32 %v2658_v0, %v2622_v9  ;;  %v2659_v16 = vadd.f32 1.0, %v5627_v1  ;;  %v2675_v3 = vadd.f32 %v2674_v10, %v2664_v4 }
 0x2d7   : > { %v2665_v19 = vmul.f32 %v2653_v8, %v2617_v12 }
 0x2d8   : > { %v2682_v23 = vadd.f32 %v2681_v18, %v2670_v14  ;;  %v2671_v17 = vmul.f32 %v2659_v16, %v2623_v20 }
 0x2d9   : > { %v2676_v24 = vadd.f32 %v2675_v3, %v2665_v19 }
 0x2da   : > { %v2683_v38 = vadd.f32 %v2682_v23, %v2671_v17 }
 0x303   : > { %v2605_v30 = vpop.f32.mrb[4].mxu0 }
 0x304   : > { %v4995_v32 = vadd.f32 %v2605_v30, %v746_v49  ;;  %v2607_v33 = vpop.f32.mrb[5].mxu0 }
 0x305   : > { %v4996_v36 = vadd.f32 %v2607_v33, %v750_v34  ;;  %v2609_v37 = vpop.f32.mrb[6].mxu0 }
 0x306   : > { %v2630_v40 = vmul.f32 0.70710677, %v4995_v32  ;;  %v4997_v41 = vadd.f32 %v2609_v37, %v746_v49  ;;  %v2611_v42 = vpop.f32.mrb[7].mxu0  ;;  %v2618_v25 = vmul.f32 0.5, %v4995_v32 }
 0x307   : > { %v2631_v45 = vmul.f32 0.70710677, %v4996_v36  ;;  %v4998_v46 = vadd.f32 %v2611_v42, %v750_v34  ;;  %v2619_v49 = vmul.f32 0.5, %v4996_v36 }
 0x308   : > { %5628 = verf.f32 %v2630_v40  ;;  %v2636_v52 = vmul.f32 0.70710677, %v4997_v41  ;;  %v2624_v29 = vmul.f32 0.5, %v4997_v41 }
 0x309   : > { %5630 = verf.f32 %v2631_v45  ;;  %v2637_v57 = vmul.f32 0.70710677, %v4998_v46  ;;  %v2625_v37 = vmul.f32 0.5, %v4998_v46 }
 0x30a   : > { %5632 = verf.f32 %v2636_v52 }
 0x30b   : > { %5634 = verf.f32 %v2637_v57 }
 0x312   : > { %v5629_v5 = vpop.eup %5628 }
 0x313   : > { %v5631_v22 = vpop.eup %5630  ;;  %v2654_v7 = vadd.f32 1.0, %v5629_v5 }
 0x314   : > { %v5633_v28 = vpop.eup %5632  ;;  %v2655_v34 = vadd.f32 1.0, %v5631_v22 }
 0x315   : > { %v5635_v48 = vpop.eup %5634  ;;  %v2660_v21 = vadd.f32 1.0, %v5633_v28  ;;  %v2666_v30 = vmul.f32 %v2654_v7, %v2618_v25 }
 0x316   : > { %v2667_v31 = vmul.f32 %v2655_v34, %v2619_v49  ;;  %v2661_v33 = vadd.f32 1.0, %v5635_v48 }
 0x317   : > { %v2672_v35 = vmul.f32 %v2660_v21, %v2624_v29  ;;  %v2677_v26 = vadd.f32 %v2676_v24, %v2666_v30  ;;  %v2747_v29 = vld [vmem:[#allocation9] sm:$0x3f] }
 0x318   : > { %v2673_v40 = vmul.f32 %v2661_v33, %v2625_v37  ;;  %v2752_v21 = vrot.slane %v2747_v29, %v6605_v54  ;;  %v2756_v24 = vrot.slane %v2747_v29, %v6607_v56  ;;  %v2760_v33 = vrot.slane %v2747_v29, %v6613_v13 }
 0x319   : > { %v2678_v39 = vadd.f32 %v2677_v26, %v2667_v31  ;;  %v2684_v42 = vadd.f32 %v2683_v38, %v2672_v35  ;;  %v2768_v37 = vrot.slane %v2747_v29, %v6620_v6  ;;  %v2772_v26 = vrot.slane %v2747_v29, %v6622_v27 }
 0x31b   : > { %2679 = vadd.xlane.f32.xlu0 %v2678_v39  ;;  %v2685_v32 = vadd.f32 %v2684_v42, %v2673_v40 }
 0x31f   : > { %2686 = vadd.xlane.f32.xlu0 %v2685_v32 }
 0x3a8   : > { %v2680_v43 = vpop.xlane.xlu0 %2679 }
 0x3a9   : > { %v2689_v36 = vmul.f32 0.0013020834, %v2680_v43 }
 0x3ab   : > { %v2691_v44 = vsub.f32 %v2662_v59, %v2689_v36  ;;  %v2692_v45 = vsub.f32 %v2663_v62, %v2689_v36  ;;  %v2693_v41 = vsub.f32 %v2664_v4, %v2689_v36  ;;  %v2694_v50 = vsub.f32 %v2665_v19, %v2689_v36 }
 0x3ac   : > { %v2687_v47 = vpop.xlane.xlu0 %2686  ;;  %v2695_v55 = vsub.f32 %v2666_v30, %v2689_v36  ;;  %v2696_v63 = vsub.f32 %v2667_v31, %v2689_v36  ;;  %v2791_v30 = vld [vmem:[#allocation11] sm:$0x3f] }
 0x3ad   : > { %v2690_v51 = vmul.f32 0.0013020834, %v2687_v47  ;;  %v2703_v52 = vmul.f32 %v2691_v44, %v2691_v44  ;;  %v2704_v53 = vmul.f32 %v2692_v45, %v2692_v45  ;;  %v2705_v46 = vmul.f32 %v2693_v41, %v2693_v41 }
 0x3ae   : > { %v2706_v0 = vmul.f32 %v2694_v50, %v2694_v50  ;;  %v2707_v8 = vmul.f32 %v2695_v55, %v2695_v55  ;;  %v2708_v12 = vmul.f32 %v2696_v63, %v2696_v63  ;;  %v2796_v32 = vrot.slane %v2791_v30, %v6605_v54 }
 0x3af   : > { %v2715_v57 = vadd.f32 %v2704_v53, %v2703_v52  ;;  %v6627_v58 = vsub.f32 %v2668_v11, %v2690_v51  ;;  %v6629_v60 = vsub.f32 %v2669_v2, %v2690_v51  ;;  %v6631_v61 = vsub.f32 %v2670_v14, %v2690_v51 }
 0x3b0   : > { %v2700_v59 = vsub.f32 %v2671_v17, %v2690_v51  ;;  %v2701_v10 = vsub.f32 %v2672_v35, %v2690_v51  ;;  %v2702_v16 = vsub.f32 %v2673_v40, %v2690_v51  ;;  %v2764_v35 = vrot.slane %v2747_v29, %v6616_v15 }
 0x3b1   : > { %v2716_v1 = vadd.f32 %v2715_v57, %v2705_v46  ;;  %v2709_v62 = vmul.f32 %v6627_v58, %v6627_v58  ;;  %v2710_v4 = vmul.f32 %v6629_v60, %v6629_v60  ;;  %v2711_v11 = vmul.f32 %v6631_v61, %v6631_v61 }
 0x3b2   : > { %v2712_v18 = vmul.f32 %v2700_v59, %v2700_v59  ;;  %v2713_v3 = vmul.f32 %v2701_v10, %v2701_v10  ;;  %v2714_v22 = vmul.f32 %v2702_v16, %v2702_v16  ;;  %v2800_v43 = vrot.slane %v2791_v30, %v6607_v56 }
 0x3b3   : > { %v2717_v9 = vadd.f32 %v2716_v1, %v2706_v0  ;;  %v2722_v2 = vadd.f32 %v2710_v4, %v2709_v62  ;;  %v2804_v46 = vrot.slane %v2791_v30, %v6613_v13  ;;  %v2808_v57 = vrot.slane %v2791_v30, %v6616_v15 }
 0x3b5   : > { %v2718_v14 = vadd.f32 %v2717_v9, %v2707_v8  ;;  %v2723_v19 = vadd.f32 %v2722_v2, %v2711_v11 }
 0x3b7   : > { %v2719_v20 = vadd.f32 %v2718_v14, %v2708_v12  ;;  %v2724_v5 = vadd.f32 %v2723_v19, %v2712_v18 }
 0x3b9   : > { %2720 = vadd.xlane.f32.xlu1 %v2719_v20  ;;  %v2725_v23 = vadd.f32 %v2724_v5, %v2713_v3 }
 0x3bb   : > { %v2726_v17 = vadd.f32 %v2725_v23, %v2714_v22 }
 0x3bd   : > { %2727 = vadd.xlane.f32.xlu1 %v2726_v17 }
 0x446   : > { %v2721_v25 = vpop.xlane.xlu1 %2720 }
 0x447   : > { %v2729_v7 = vmul.f32 0.0013020834, %v2721_v25 }
 0x449   : > { %v2731_v28 = vadd.f32 1e-12, %v2729_v7 }
 0x44a   : > { %v2728_v49 = vpop.xlane.xlu1 %2727 }
 0x44b   : > { %5636 = vrsqrt.f32 %v2731_v28  ;;  %v2730_v34 = vmul.f32 0.0013020834, %v2728_v49 }
 0x44d   : > { %v2732_v48 = vadd.f32 1e-12, %v2730_v34 }
 0x44f   : > { %5638 = vrsqrt.f32 %v2732_v48 }
 0x455   : > { %v5637_v31 = vpop.eup %5636 }
 0x456   : > { %v2735_v38 = vmul.f32 %v5637_v31, %v2691_v44  ;;  %v2736_v39 = vmul.f32 %v5637_v31, %v2692_v45  ;;  %v2737_v40 = vmul.f32 %v5637_v31, %v2693_v41  ;;  %v2738_v42 = vmul.f32 %v5637_v31, %v2694_v50 }
 0x457   : > { %v2739_v36 = vmul.f32 %v5637_v31, %v2695_v55  ;;  %v2740_v47 = vmul.f32 %v5637_v31, %v2696_v63  ;;  %v2812_v44 = vrot.slane %v2791_v30, %v6620_v6  ;;  %v2816_v45 = vrot.slane %v2791_v30, %v6622_v27 }
 0x458   : > { %v2779_v51 = vmul.f32 %v2752_v21, %v2735_v38  ;;  %v2780_v52 = vmul.f32 %v2756_v24, %v2736_v39  ;;  %v2781_v0 = vmul.f32 %v2760_v33, %v2737_v40  ;;  %v2782_v1 = vmul.f32 %v2764_v35, %v2738_v42 }
 0x459   : > { %v5639_v53 = vpop.eup %5638  ;;  %v2783_v41 = vmul.f32 %v2768_v37, %v2739_v36  ;;  %v2784_v50 = vmul.f32 %v2772_v26, %v2740_v47 }
 0x45a   : > { %v2823_v54 = vadd.f32 %v2796_v32, %v2779_v51  ;;  %v2824_v62 = vadd.f32 %v2800_v43, %v2780_v52  ;;  %v2741_v56 = vmul.f32 %v5639_v53, %v6627_v58  ;;  %v2742_v55 = vmul.f32 %v5639_v53, %v6629_v60 }
 0x45b   : > { %v2743_v63 = vmul.f32 %v5639_v53, %v6631_v61  ;;  %v2744_v4 = vmul.f32 %v5639_v53, %v2700_v59  ;;  %v2745_v13 = vmul.f32 %v5639_v53, %v2701_v10  ;;  %v2746_v8 = vmul.f32 %v5639_v53, %v2702_v16 }
 0x45c   : > { %v2825_v15 = vadd.f32 %v2804_v46, %v2781_v0  ;;  %v2826_v9 = vadd.f32 %v2808_v57, %v2782_v1  ;;  %v2785_v11 = vmul.f32 %v2752_v21, %v2741_v56  ;;  %v2786_v2 = vmul.f32 %v2756_v24, %v2742_v55 }
 0x45d   : > { %v2787_v6 = vmul.f32 %v2760_v33, %v2743_v63  ;;  %v2788_v12 = vmul.f32 %v2764_v35, %v2744_v4  ;;  %v2789_v27 = vmul.f32 %v2768_v37, %v2745_v13  ;;  %v2790_v14 = vmul.f32 %v2772_v26, %v2746_v8 }
 0x45e   : > { %v2827_v18 = vadd.f32 %v2812_v44, %v2783_v41  ;;  %v2828_v19 = vadd.f32 %v2816_v45, %v2784_v50  ;;  %v2829_v20 = vadd.f32 %v2796_v32, %v2785_v11  ;;  %v2830_v3 = vadd.f32 %v2800_v43, %v2786_v2 }
 0x45f   : > { %v2831_v58 = vadd.f32 %v2804_v46, %v2787_v6  ;;  %v2832_v5 = vadd.f32 %v2808_v57, %v2788_v12  ;;  %v2833_v60 = vadd.f32 %v2812_v44, %v2789_v27  ;;  %v2834_v22 = vadd.f32 %v2816_v45, %v2790_v14 }
 0x460   : > { %v2835_v61 = vpack.c.bf16 %v2829_v20, %v2823_v54  ;;  %v2836_v59 = vpack.c.bf16 %v2830_v3, %v2824_v62 }
 0x461   : > { %v2837_v10 = vpack.c.bf16 %v2831_v58, %v2825_v15  ;;  %v2838_v16 = vpack.c.bf16 %v2832_v5, %v2826_v9  ;;  %v2839_v23 = vpack.c.bf16 %v2833_v60, %v2827_v18  ;;  %v2840_v17 = vpack.c.bf16 %v2834_v22, %v2828_v19 }
 0x462   : > { %2841 = vst [vmem:[#allocation2] sm:$0xff] %v2835_v61  ;;  %2842 = vst [vmem:[#allocation2 + $0x8] sm:$0xff] %v2836_v59 }
 0x463   : > { %2843 = vst [vmem:[#allocation2 + $0x10] sm:$0xff] %v2837_v10  ;;  %2844 = vst [vmem:[#allocation2 + $0x18] sm:$0xff] %v2838_v16 }
 0x464   : > { %2845 = vst [vmem:[#allocation2 + $0x20] sm:$0xff] %v2839_v23  ;;  %2846 = vst [vmem:[#allocation2 + $0x28] sm:$0xff] %v2840_v17 }
 0x465 PF: > { %v5642_v25 = vld [vmem:[%s6564_s5 + $0x4] ss:$16 sps:$4 sm:$0xff]   ;;  %v5644_v7 = vld [vmem:[%s6564_s5 + $0xc] ss:$16 sps:$4 sm:$0xff]   ;;  %v5646_v28 = vld [vmem:[%s6564_s5] ss:$16 sps:$4 sm:$0xff]  }
 0x466   : > { %4027 = vmatprep.subr.bf16.mxu0 %v5642_v25  ;;  %v5647_v49 = vld [vmem:[%s6564_s5 + $0x8] ss:$16 sps:$4 sm:$0xff]   ;;  %4156 = vmatprep.subr.bf16.mxu1 %v5644_v7  ;;  %v5648_v34 = vld [vmem:[%s6564_s5 + $0x24] ss:$16 sps:$4 sm:$0xff]   ;;  %v5650_v48 = vld [vmem:[%s6564_s5 + $0x2c] ss:$16 sps:$4 sm:$0xff]  }
 0x467   : > { %4028 = vmatpush1.bf16.msra.mxu0 %v5646_v28  ;;  %4157 = vmatpush1.bf16.msra.mxu1 %v5647_v49  ;;  %v5652_v29 = vld [vmem:[%s6564_s5 + $0x20] ss:$16 sps:$4 sm:$0xff]   ;;  %v5653_v21 = vld [vmem:[%s6564_s5 + $0x28] ss:$16 sps:$4 sm:$0xff]   ;;  %v5654_v30 = vld [vmem:[%s6564_s5 + $0x44] ss:$16 sps:$4 sm:$0xff]  }
 0x468   : > { %4029 = vmatprep.subr.bf16.mxu0 %v5648_v34  ;;  %4158 = vmatprep.subr.bf16.mxu1 %v5650_v48  ;;  %v5656_v24 = vld [vmem:[%s6564_s5 + $0x4c] ss:$16 sps:$4 sm:$0xff]   ;;  %v5658_v31 = vld [vmem:[%s6564_s5 + $0x40] ss:$16 sps:$4 sm:$0xff]   ;;  %v5659_v33 = vld [vmem:[%s6564_s5 + $0x48] ss:$16 sps:$4 sm:$0xff]  }
 0x469   : > { %v5660_v35 = vld [vmem:[%s6564_s5 + $0x64] ss:$16 sps:$4 sm:$0xff]   ;;  %v5662_v37 = vld [vmem:[%s6564_s5 + $0x6c] ss:$16 sps:$4 sm:$0xff]   ;;  %v5664_v26 = vld [vmem:[%s6564_s5 + $0x60] ss:$16 sps:$4 sm:$0xff]  }
 0x46a   : > { %v5665_v38 = vld [vmem:[%s6564_s5 + $0x68] ss:$16 sps:$4 sm:$0xff]   ;;  %v5666_v39 = vld [vmem:[%s6564_s5 + $0x84] ss:$16 sps:$4 sm:$0xff]   ;;  %v5668_v40 = vld [vmem:[%s6564_s5 + $0x8c] ss:$16 sps:$4 sm:$0xff]  }
 0x46b   : > { %4030 = vmatpush1.bf16.msra.mxu0 %v5652_v29  ;;  %4159 = vmatpush1.bf16.msra.mxu1 %v5653_v21  ;;  %v5670_v42 = vld [vmem:[%s6564_s5 + $0x80] ss:$16 sps:$4 sm:$0xff]   ;;  %v5671_v32 = vld [vmem:[%s6564_s5 + $0x88] ss:$16 sps:$4 sm:$0xff]   ;;  %v5672_v43 = vld [vmem:[%s6564_s5 + $0xa4] ss:$16 sps:$4 sm:$0xff]  }
 0x46c   : > { %4031 = vmatprep.subr.bf16.mxu0 %v5654_v30  ;;  %4160 = vmatprep.subr.bf16.mxu1 %v5656_v24  ;;  %v5674_v36 = vld [vmem:[%s6564_s5 + $0xac] ss:$16 sps:$4 sm:$0xff]   ;;  %v5676_v47 = vld [vmem:[%s6564_s5 + $0xa0] ss:$16 sps:$4 sm:$0xff]   ;;  %v5677_v51 = vld [vmem:[%s6564_s5 + $0xa8] ss:$16 sps:$4 sm:$0xff]  }
 0x46d   : > { %v5678_v52 = vld [vmem:[%s6564_s5 + $0xc4] ss:$16 sps:$4 sm:$0xff]   ;;  %v5680_v53 = vld [vmem:[%s6564_s5 + $0xcc] ss:$16 sps:$4 sm:$0xff]   ;;  %v5682_v46 = vld [vmem:[%s6564_s5 + $0xc0] ss:$16 sps:$4 sm:$0xff]  }
 0x46e   : > { %v5683_v57 = vld [vmem:[%s6564_s5 + $0xc8] ss:$16 sps:$4 sm:$0xff]   ;;  %v5684_v0 = vld [vmem:[%s6564_s5 + $0xe4] ss:$16 sps:$4 sm:$0xff]   ;;  %v5686_v1 = vld [vmem:[%s6564_s5 + $0xec] ss:$16 sps:$4 sm:$0xff]  }
 0x46f   : > { %4032 = vmatpush1.bf16.msra.mxu0 %v5658_v31  ;;  %4161 = vmatpush1.bf16.msra.mxu1 %v5659_v33  ;;  %v5688_v44 = vld [vmem:[%s6564_s5 + $0xe0] ss:$16 sps:$4 sm:$0xff]   ;;  %v5689_v45 = vld [vmem:[%s6564_s5 + $0xe8] ss:$16 sps:$4 sm:$0xff]   ;;  %v5690_v41 = vld [vmem:[%s6564_s5 + $0x104] ss:$16 sps:$4 sm:$0xff]  }
 0x470   : > { %4033 = vmatprep.subr.bf16.mxu0 %v5660_v35  ;;  %4162 = vmatprep.subr.bf16.mxu1 %v5662_v37  ;;  %v5692_v50 = vld [vmem:[%s6564_s5 + $0x10c] ss:$16 sps:$4 sm:$0xff]   ;;  %v5694_v54 = vld [vmem:[%s6564_s5 + $0x100] ss:$16 sps:$4 sm:$0xff]   ;;  %v5695_v62 = vld [vmem:[%s6564_s5 + $0x108] ss:$16 sps:$4 sm:$0xff]  }
 0x471   : > { %v5696_v56 = vld [vmem:[%s6564_s5 + $0x124] ss:$16 sps:$4 sm:$0xff]   ;;  %v5698_v55 = vld [vmem:[%s6564_s5 + $0x12c] ss:$16 sps:$4 sm:$0xff]   ;;  %v5700_v63 = vld [vmem:[%s6564_s5 + $0x120] ss:$16 sps:$4 sm:$0xff]  }
 0x472   : > { %v5701_v4 = vld [vmem:[%s6564_s5 + $0x128] ss:$16 sps:$4 sm:$0xff]   ;;  %v5702_v13 = vld [vmem:[%s6564_s5 + $0x144] ss:$16 sps:$4 sm:$0xff]   ;;  %v5704_v8 = vld [vmem:[%s6564_s5 + $0x14c] ss:$16 sps:$4 sm:$0xff]  }
 0x473   : > { %4034 = vmatpush1.bf16.msra.mxu0 %v5664_v26  ;;  %4163 = vmatpush1.bf16.msra.mxu1 %v5665_v38  ;;  %v5706_v15 = vld [vmem:[%s6564_s5 + $0x140] ss:$16 sps:$4 sm:$0xff]   ;;  %v5707_v9 = vld [vmem:[%s6564_s5 + $0x148] ss:$16 sps:$4 sm:$0xff]   ;;  %v5708_v11 = vld [vmem:[%s6564_s5 + $0x164] ss:$16 sps:$4 sm:$0xff]  }
 0x474   : > { %4035 = vmatprep.subr.bf16.mxu0 %v5666_v39  ;;  %4164 = vmatprep.subr.bf16.mxu1 %v5668_v40  ;;  %v5710_v2 = vld [vmem:[%s6564_s5 + $0x16c] ss:$16 sps:$4 sm:$0xff]   ;;  %v5712_v12 = vld [vmem:[%s6564_s5 + $0x160] ss:$16 sps:$4 sm:$0xff]   ;;  %v5713_v27 = vld [vmem:[%s6564_s5 + $0x168] ss:$16 sps:$4 sm:$0xff]  }
 0x475   : > { %v2848_v6 = vld [vmem:[#allocation2 + $0x8] sm:$0xff]  ;;  %v5718_v19 = vld [vmem:[%s6564_s5 + $0x180] ss:$16 sps:$4 sm:$0xff]   ;;  %s4982_s30 = sshll.u32 %s6216_s27, 9  ;;  %s4310_s9 = sshll.u32 %s6574_s1, 4  ;;  %s6856_s9 = int_to_ptr.vmem [resolvable:$true] %s4310_s9 }
 0x476   : > { %4059 = vmatprep.mubr.bf16.mxu0 %v2848_v6  ;;  %4188 = vmatprep.mubr.bf16.mxu1 %v2848_v6  ;;  %v5714_v14 = vld [vmem:[%s6564_s5 + $0x184] ss:$16 sps:$4 sm:$0xff]   ;;  %v5716_v18 = vld [vmem:[%s6564_s5 + $0x18c] ss:$16 sps:$4 sm:$0xff]   ;;  %v5719_v20 = vld [vmem:[%s6564_s5 + $0x188] ss:$16 sps:$4 sm:$0xff]   ;;  %s6852_s27 = scalar_lea.hbm %s6918_s7, %s4982_s30 }
 0x477   : > { %4036 = vmatpush1.bf16.msra.mxu0 %v5670_v42  ;;  %4165 = vmatpush1.bf16.msra.mxu1 %v5671_v32  ;;  %v5720_v3 = vld [vmem:[%s6564_s5 + $0x1a4] ss:$16 sps:$4 sm:$0xff]   ;;  %v5722_v58 = vld [vmem:[%s6564_s5 + $0x1ac] ss:$16 sps:$4 sm:$0xff]   ;;  %v5724_v5 = vld [vmem:[%s6564_s5 + $0x1a0] ss:$16 sps:$4 sm:$0xff]  }
 0x478   : > { %4037 = vmatprep.subr.bf16.mxu0 %v5672_v43  ;;  %4166 = vmatprep.subr.bf16.mxu1 %v5674_v36  ;;  %v5725_v60 = vld [vmem:[%s6564_s5 + $0x1a8] ss:$16 sps:$4 sm:$0xff]   ;;  %v5726_v22 = vld [vmem:[%s6564_s5 + $0x1c4] ss:$16 sps:$4 sm:$0xff]   ;;  %v5728_v61 = vld [vmem:[%s6564_s5 + $0x1cc] ss:$16 sps:$4 sm:$0xff]  }
 0x479   : > { %v5730_v59 = vld [vmem:[%s6564_s5 + $0x1c0] ss:$16 sps:$4 sm:$0xff]   ;;  %v5731_v10 = vld [vmem:[%s6564_s5 + $0x1c8] ss:$16 sps:$4 sm:$0xff]   ;;  %v5732_v16 = vld [vmem:[%s6564_s5 + $0x1e4] ss:$16 sps:$4 sm:$0xff]  }
 0x47a   : > { %v5734_v23 = vld [vmem:[%s6564_s5 + $0x1ec] ss:$16 sps:$4 sm:$0xff]   ;;  %v5736_v17 = vld [vmem:[%s6564_s5 + $0x1e0] ss:$16 sps:$4 sm:$0xff]   ;;  %v5737_v25 = vld [vmem:[%s6564_s5 + $0x1e8] ss:$16 sps:$4 sm:$0xff]  }
 0x47b   : > { %4038 = vmatpush1.bf16.msra.mxu0 %v5676_v47  ;;  %4167 = vmatpush1.bf16.msra.mxu1 %v5677_v51  ;;  %v5740_v7 = vld [vmem:[%s6564_s5 + $0x204] ss:$16 sps:$4 sm:$0xff]   ;;  %v5743_v28 = vld [vmem:[%s6564_s5 + $0x20c] ss:$16 sps:$4 sm:$0xff]   ;;  %v5738_v49 = vld [vmem:[%s6564_s5 + $0x200] ss:$16 sps:$4 sm:$0xff]  }
 0x47c   : > { %4039 = vmatprep.subr.bf16.mxu0 %v5678_v52  ;;  %4168 = vmatprep.subr.bf16.mxu1 %v5680_v53  ;;  %v5741_v34 = vld [vmem:[%s6564_s5 + $0x208] ss:$16 sps:$4 sm:$0xff]   ;;  %v2847_v48 = vld [vmem:[#allocation2] sm:$0xff]  ;;  %s6973_s24 = sld [smem:[#allocation25_spill]]  ;;  %s4294_s13 = scalar_lea.sflag [#allocation5], %s6561_s17 }
 0x47d   : > { %v5746_v29 = vld [vmem:[%s6564_s5 + $0x224] ss:$16 sps:$4 sm:$0xff]   ;;  %v5749_v21 = vld [vmem:[%s6564_s5 + $0x22c] ss:$16 sps:$4 sm:$0xff]   ;;  %v5744_v30 = vld [vmem:[%s6564_s5 + $0x220] ss:$16 sps:$4 sm:$0xff]  }
 0x47e   : > { %v5747_v24 = vld [vmem:[%s6564_s5 + $0x228] ss:$16 sps:$4 sm:$0xff]   ;;  %v5752_v31 = vld [vmem:[%s6564_s5 + $0x244] ss:$16 sps:$4 sm:$0xff]   ;;  %v5755_v33 = vld [vmem:[%s6564_s5 + $0x24c] ss:$16 sps:$4 sm:$0xff]  }
 0x47f   : > { %4040 = vmatpush1.bf16.msra.mxu0 %v5682_v46  ;;  %4169 = vmatpush1.bf16.msra.mxu1 %v5683_v57  ;;  %v5750_v35 = vld [vmem:[%s6564_s5 + $0x240] ss:$16 sps:$4 sm:$0xff]   ;;  %v5753_v37 = vld [vmem:[%s6564_s5 + $0x248] ss:$16 sps:$4 sm:$0xff]   ;;  %v5758_v26 = vld [vmem:[%s6564_s5 + $0x264] ss:$16 sps:$4 sm:$0xff]  }
 0x480   : > { %4041 = vmatprep.subr.bf16.mxu0 %v5684_v0  ;;  %4170 = vmatprep.subr.bf16.mxu1 %v5686_v1  ;;  %v5761_v38 = vld [vmem:[%s6564_s5 + $0x26c] ss:$16 sps:$4 sm:$0xff]   ;;  %v5756_v39 = vld [vmem:[%s6564_s5 + $0x260] ss:$16 sps:$4 sm:$0xff]   ;;  %v5759_v40 = vld [vmem:[%s6564_s5 + $0x268] ss:$16 sps:$4 sm:$0xff]  }
 0x481   : > { %v5764_v42 = vld [vmem:[%s6564_s5 + $0x284] ss:$16 sps:$4 sm:$0xff]   ;;  %v5767_v32 = vld [vmem:[%s6564_s5 + $0x28c] ss:$16 sps:$4 sm:$0xff]   ;;  %v5762_v43 = vld [vmem:[%s6564_s5 + $0x280] ss:$16 sps:$4 sm:$0xff]  }
 0x482   : > { %v5765_v36 = vld [vmem:[%s6564_s5 + $0x288] ss:$16 sps:$4 sm:$0xff]   ;;  %v5770_v47 = vld [vmem:[%s6564_s5 + $0x2a4] ss:$16 sps:$4 sm:$0xff]   ;;  %v5773_v51 = vld [vmem:[%s6564_s5 + $0x2ac] ss:$16 sps:$4 sm:$0xff]  }
 0x483   : > { %4042 = vmatpush1.bf16.msra.mxu0 %v5688_v44  ;;  %4171 = vmatpush1.bf16.msra.mxu1 %v5689_v45  ;;  %v5768_v52 = vld [vmem:[%s6564_s5 + $0x2a0] ss:$16 sps:$4 sm:$0xff]   ;;  %v5771_v53 = vld [vmem:[%s6564_s5 + $0x2a8] ss:$16 sps:$4 sm:$0xff]   ;;  %v5776_v46 = vld [vmem:[%s6564_s5 + $0x2c4] ss:$16 sps:$4 sm:$0xff]  }
 0x484   : > { %4043 = vmatprep.subr.bf16.mxu0 %v5690_v41  ;;  %4172 = vmatprep.subr.bf16.mxu1 %v5692_v50  ;;  %v5779_v57 = vld [vmem:[%s6564_s5 + $0x2cc] ss:$16 sps:$4 sm:$0xff]   ;;  %v5774_v1 = vld [vmem:[%s6564_s5 + $0x2c0] ss:$16 sps:$4 sm:$0xff]   ;;  %v5777_v44 = vld [vmem:[%s6564_s5 + $0x2c8] ss:$16 sps:$4 sm:$0xff]  }
 0x485   : > { %v2850_v0 = vld [vmem:[#allocation2 + $0x18] sm:$0xff]  ;;  %v5780_v50 = vld [vmem:[%s6564_s5 + $0x2e0] ss:$16 sps:$4 sm:$0xff]   ;;  %s6130_s23 = scalar_lea.vmem %s6856_s9, 1024  ;;  %p6974_p3 = scmp.ne.s32.totalorder %s6973_s24, 0 }
 0x486   : > { %v5782_v45 = vld [vmem:[%s6564_s5 + $0x2e4] ss:$16 sps:$4 sm:$0xff]   ;;  %v5785_v41 = vld [vmem:[%s6564_s5 + $0x2ec] ss:$16 sps:$4 sm:$0xff]   ;;  %v5801_v6 = vld [vmem:[%s6564_s5 + $0x348] ss:$16 sps:$4 sm:$0xff]   ;;  %p6131_p13 = scmp.ne.s32.totalorder %s6856_s9, %s6130_s23 }
 0x487   : > { %4044 = vmatpush1.bf16.msra.mxu0 %v5694_v54  ;;  %4173 = vmatpush1.bf16.msra.mxu1 %v5695_v62  ;;  %v5783_v54 = vld [vmem:[%s6564_s5 + $0x2e8] ss:$16 sps:$4 sm:$0xff]   ;;  %v5788_v62 = vld [vmem:[%s6564_s5 + $0x304] ss:$16 sps:$4 sm:$0xff]   ;;  %s6238_s21 = smov [#allocation15]  }
 0x488   : > { %4045 = vmatprep.subr.bf16.mxu0 %v5696_v56  ;;  %4174 = vmatprep.subr.bf16.mxu1 %v5698_v55  ;;  %v5791_v56 = vld [vmem:[%s6564_s5 + $0x30c] ss:$16 sps:$4 sm:$0xff]   ;;  %v5786_v55 = vld [vmem:[%s6564_s5 + $0x300] ss:$16 sps:$4 sm:$0xff]   ;;  %p6132_p12 = pnand %p6131_p13, %p6974_p3  ;;  %s6134_s3 = sshll.u32 %s6238_s21, 4  ;;  %s6135_s3 = int_to_ptr.vmem [resolvable:$false] %s6134_s3 }
 0x489   : > { %s6136_s12 = scalar_lea.vmem %s6135_s3, 2048  ;;  %p6137_p11 = scmp.lt.s32.totalorder %s6856_s9, %s6135_s3 }
 0x48a   : > { %p6133_p8 = pneg %p6132_p12  ;;  %p6138_p1 = scmp.lt.s32.totalorder %s6136_s12, %s6130_s23 }
 0x48b   : > { %4046 = vmatpush1.bf16.msra.mxu0 %v5700_v63  ;;  %4175 = vmatpush1.bf16.msra.mxu1 %v5701_v4  ;;  %v5789_v63 = vld [vmem:[%s6564_s5 + $0x308] ss:$16 sps:$4 sm:$0xff]   ;;  %v5794_v4 = vld [vmem:[%s6564_s5 + $0x324] ss:$16 sps:$4 sm:$0xff]  }
 0x48c   : > { %4047 = vmatprep.subr.bf16.mxu0 %v5702_v13  ;;  %4176 = vmatprep.subr.bf16.mxu1 %v5704_v8  ;;  %v5797_v13 = vld [vmem:[%s6564_s5 + $0x32c] ss:$16 sps:$4 sm:$0xff]   ;;  %v5792_v8 = vld [vmem:[%s6564_s5 + $0x320] ss:$16 sps:$4 sm:$0xff]   ;;  %p6139_p9 = por %p6138_p1, %p6137_p11 }
 0x48e   : > { %p6140_p0 = pnand %p6139_p9, %p6133_p8 }
 0x48f   : > { %4048 = vmatpush1.bf16.msra.mxu0 %v5706_v15  ;;  %4177 = vmatpush1.bf16.msra.mxu1 %v5707_v9  ;;  %v5795_v15 = vld [vmem:[%s6564_s5 + $0x328] ss:$16 sps:$4 sm:$0xff]   ;;  %v5800_v9 = vld [vmem:[%s6564_s5 + $0x344] ss:$16 sps:$4 sm:$0xff]  }
 0x490   : > { %4049 = vmatprep.subr.bf16.mxu0 %v5708_v11  ;;  %4178 = vmatprep.subr.bf16.mxu1 %v5710_v2  ;;  %v5803_v11 = vld [vmem:[%s6564_s5 + $0x34c] ss:$16 sps:$4 sm:$0xff]   ;;  %v5798_v2 = vld [vmem:[%s6564_s5 + $0x340] ss:$16 sps:$4 sm:$0xff]  }
 0x493   : > { %4050 = vmatpush1.bf16.msra.mxu0 %v5712_v12  ;;  %4179 = vmatpush1.bf16.msra.mxu1 %v5713_v27  ;;  %v5806_v12 = vld [vmem:[%s6564_s5 + $0x364] ss:$16 sps:$4 sm:$0xff]   ;;  %v5809_v27 = vld [vmem:[%s6564_s5 + $0x36c] ss:$16 sps:$4 sm:$0xff]  }
 0x494   : > { %4051 = vmatprep.subr.bf16.mxu0 %v5714_v14  ;;  %4180 = vmatprep.subr.bf16.mxu1 %v5716_v18  ;;  %v5804_v14 = vld [vmem:[%s6564_s5 + $0x360] ss:$16 sps:$4 sm:$0xff]   ;;  %v5807_v18 = vld [vmem:[%s6564_s5 + $0x368] ss:$16 sps:$4 sm:$0xff]  }
 0x497   : > { %4052 = vmatpush1.bf16.msra.mxu0 %v5718_v19  ;;  %4181 = vmatpush1.bf16.msra.mxu1 %v5719_v20  ;;  %v5812_v19 = vld [vmem:[%s6564_s5 + $0x384] ss:$16 sps:$4 sm:$0xff]   ;;  %v5815_v20 = vld [vmem:[%s6564_s5 + $0x38c] ss:$16 sps:$4 sm:$0xff]  }
 0x498   : > { %4053 = vmatprep.subr.bf16.mxu0 %v5720_v3  ;;  %4182 = vmatprep.subr.bf16.mxu1 %v5722_v58  ;;  %v5810_v3 = vld [vmem:[%s6564_s5 + $0x380] ss:$16 sps:$4 sm:$0xff]   ;;  %v5813_v58 = vld [vmem:[%s6564_s5 + $0x388] ss:$16 sps:$4 sm:$0xff]  }
 0x49b   : > { %4054 = vmatpush1.bf16.msra.mxu0 %v5724_v5  ;;  %4183 = vmatpush1.bf16.msra.mxu1 %v5725_v60  ;;  %v5818_v5 = vld [vmem:[%s6564_s5 + $0x3a4] ss:$16 sps:$4 sm:$0xff]   ;;  %v5821_v60 = vld [vmem:[%s6564_s5 + $0x3ac] ss:$16 sps:$4 sm:$0xff]  }
 0x49c   : > { %4055 = vmatprep.subr.bf16.mxu0 %v5726_v22  ;;  %4184 = vmatprep.subr.bf16.mxu1 %v5728_v61  ;;  %v5816_v22 = vld [vmem:[%s6564_s5 + $0x3a0] ss:$16 sps:$4 sm:$0xff]   ;;  %v5819_v61 = vld [vmem:[%s6564_s5 + $0x3a8] ss:$16 sps:$4 sm:$0xff]  }
 0x49f   : > { %4056 = vmatpush1.bf16.msra.mxu0 %v5730_v59  ;;  %4185 = vmatpush1.bf16.msra.mxu1 %v5731_v10  ;;  %v5824_v59 = vld [vmem:[%s6564_s5 + $0x3c4] ss:$16 sps:$4 sm:$0xff]   ;;  %v5827_v10 = vld [vmem:[%s6564_s5 + $0x3cc] ss:$16 sps:$4 sm:$0xff]  }
 0x4a0   : > { %4057 = vmatprep.subr.bf16.mxu0 %v5732_v16  ;;  %4186 = vmatprep.subr.bf16.mxu1 %v5734_v23  ;;  %v5822_v16 = vld [vmem:[%s6564_s5 + $0x3c0] ss:$16 sps:$4 sm:$0xff]   ;;  %v5825_v23 = vld [vmem:[%s6564_s5 + $0x3c8] ss:$16 sps:$4 sm:$0xff]  }
 0x4a3   : > { %4058 = vmatpush1.bf16.msra.mxu0 %v5736_v17  ;;  %4187 = vmatpush1.bf16.msra.mxu1 %v5737_v25  ;;  %v5830_v17 = vld [vmem:[%s6564_s5 + $0x3e4] ss:$16 sps:$4 sm:$0xff]   ;;  %v5833_v25 = vld [vmem:[%s6564_s5 + $0x3ec] ss:$16 sps:$4 sm:$0xff]  }
 0x4a4   : > { %4070 = vmatprep.subr.bf16.mxu0 %v5740_v7  ;;  %4199 = vmatprep.subr.bf16.mxu1 %v5743_v28  ;;  %v5828_v7 = vld [vmem:[%s6564_s5 + $0x3e0] ss:$16 sps:$4 sm:$0xff]   ;;  %v5831_v28 = vld [vmem:[%s6564_s5 + $0x3e8] ss:$16 sps:$4 sm:$0xff]  }
 0x4a6   : > { %4060 = vmatmul.mubr.bf16.vlgmr.msra.gmra.mrb[0].mxu0 %v2847_v48  ;;  %4189 = vmatmul.mubr.bf16.vlgmr.msra.gmra.mrb[0].mxu1 %v2847_v48  ;;  %v5834_v48 = vld [vmem:[%s6564_s5 + $0x400] ss:$16 sps:$4 sm:$0xff]  }
 0x4a7   : > { %4071 = vmatpush1.bf16.msra.mxu0 %v5738_v49  ;;  %4200 = vmatpush1.bf16.msra.mxu1 %v5741_v34  ;;  %v5836_v49 = vld [vmem:[%s6564_s5 + $0x404] ss:$16 sps:$4 sm:$0xff]   ;;  %v5839_v34 = vld [vmem:[%s6564_s5 + $0x40c] ss:$16 sps:$4 sm:$0xff]  }
 0x4a8   : > { %4072 = vmatprep.subr.bf16.mxu0 %v5746_v29  ;;  %4201 = vmatprep.subr.bf16.mxu1 %v5749_v21  ;;  %v5837_v29 = vld [vmem:[%s6564_s5 + $0x408] ss:$16 sps:$4 sm:$0xff]   ;;  %v2849_v21 = vld [vmem:[#allocation2 + $0x10] sm:$0xff] }
 0x4a9   : > { %4102 = vmatprep.mubr.bf16.mxu0 %v2850_v0  ;;  %4231 = vmatprep.mubr.bf16.mxu1 %v2850_v0  ;;  %v5867_v0 = vld [vmem:[%s6564_s5 + $0x4a8] ss:$16 sps:$4 sm:$0xff]  }
 0x4ab   : > { %4073 = vmatpush1.bf16.msra.mxu0 %v5744_v30  ;;  %4202 = vmatpush1.bf16.msra.mxu1 %v5747_v24  ;;  %v5842_v30 = vld [vmem:[%s6564_s5 + $0x424] ss:$16 sps:$4 sm:$0xff]   ;;  %v5845_v24 = vld [vmem:[%s6564_s5 + $0x42c] ss:$16 sps:$4 sm:$0xff]  }
 0x4ac   : > { %4074 = vmatprep.subr.bf16.mxu0 %v5752_v31  ;;  %4203 = vmatprep.subr.bf16.mxu1 %v5755_v33  ;;  %v2852_v31 = vld [vmem:[#allocation2 + $0x28] sm:$0xff]  ;;  %v5840_v33 = vld [vmem:[%s6564_s5 + $0x420] ss:$16 sps:$4 sm:$0xff]  }
 0x4af   : > { %4075 = vmatpush1.bf16.msra.mxu0 %v5750_v35  ;;  %4204 = vmatpush1.bf16.msra.mxu1 %v5753_v37  ;;  %v5843_v35 = vld [vmem:[%s6564_s5 + $0x428] ss:$16 sps:$4 sm:$0xff]   ;;  %v5848_v37 = vld [vmem:[%s6564_s5 + $0x444] ss:$16 sps:$4 sm:$0xff]  }
 0x4b0   : > { %4076 = vmatprep.subr.bf16.mxu0 %v5758_v26  ;;  %4205 = vmatprep.subr.bf16.mxu1 %v5761_v38  ;;  %v5851_v26 = vld [vmem:[%s6564_s5 + $0x44c] ss:$16 sps:$4 sm:$0xff]   ;;  %v5846_v38 = vld [vmem:[%s6564_s5 + $0x440] ss:$16 sps:$4 sm:$0xff]  }
 0x4b3   : > { %4077 = vmatpush1.bf16.msra.mxu0 %v5756_v39  ;;  %4206 = vmatpush1.bf16.msra.mxu1 %v5759_v40  ;;  %v5849_v39 = vld [vmem:[%s6564_s5 + $0x448] ss:$16 sps:$4 sm:$0xff]   ;;  %v5854_v40 = vld [vmem:[%s6564_s5 + $0x464] ss:$16 sps:$4 sm:$0xff]  }
 0x4b4   : > { %4078 = vmatprep.subr.bf16.mxu0 %v5764_v42  ;;  %4207 = vmatprep.subr.bf16.mxu1 %v5767_v32  ;;  %v5857_v42 = vld [vmem:[%s6564_s5 + $0x46c] ss:$16 sps:$4 sm:$0xff]   ;;  %v5852_v32 = vld [vmem:[%s6564_s5 + $0x460] ss:$16 sps:$4 sm:$0xff]  }
 0x4b7   : > { %4079 = vmatpush1.bf16.msra.mxu0 %v5762_v43  ;;  %4208 = vmatpush1.bf16.msra.mxu1 %v5765_v36  ;;  %v5855_v43 = vld [vmem:[%s6564_s5 + $0x468] ss:$16 sps:$4 sm:$0xff]   ;;  %v5860_v36 = vld [vmem:[%s6564_s5 + $0x484] ss:$16 sps:$4 sm:$0xff]  }
 0x4b8   : > { %4080 = vmatprep.subr.bf16.mxu0 %v5770_v47  ;;  %4209 = vmatprep.subr.bf16.mxu1 %v5773_v51  ;;  %v5863_v47 = vld [vmem:[%s6564_s5 + $0x48c] ss:$16 sps:$4 sm:$0xff]   ;;  %v5858_v51 = vld [vmem:[%s6564_s5 + $0x480] ss:$16 sps:$4 sm:$0xff]  }
 0x4bb   : > { %4081 = vmatpush1.bf16.msra.mxu0 %v5768_v52  ;;  %4210 = vmatpush1.bf16.msra.mxu1 %v5771_v53  ;;  %v5861_v52 = vld [vmem:[%s6564_s5 + $0x488] ss:$16 sps:$4 sm:$0xff]   ;;  %v5866_v53 = vld [vmem:[%s6564_s5 + $0x4a4] ss:$16 sps:$4 sm:$0xff]  }
 0x4bc   : > { %4082 = vmatprep.subr.bf16.mxu0 %v5776_v46  ;;  %4211 = vmatprep.subr.bf16.mxu1 %v5779_v57  ;;  %v5869_v46 = vld [vmem:[%s6564_s5 + $0x4ac] ss:$16 sps:$4 sm:$0xff]   ;;  %v5864_v57 = vld [vmem:[%s6564_s5 + $0x4a0] ss:$16 sps:$4 sm:$0xff]  }
 0x4bf   : > { %4083 = vmatpush1.bf16.msra.mxu0 %v5774_v1  ;;  %4212 = vmatpush1.bf16.msra.mxu1 %v5777_v44  ;;  %v5872_v1 = vld [vmem:[%s6564_s5 + $0x4c4] ss:$16 sps:$4 sm:$0xff]   ;;  %v5875_v44 = vld [vmem:[%s6564_s5 + $0x4cc] ss:$16 sps:$4 sm:$0xff]  }
 0x4c0   : > { %4084 = vmatprep.subr.bf16.mxu0 %v5782_v45  ;;  %4213 = vmatprep.subr.bf16.mxu1 %v5785_v41  ;;  %v5870_v45 = vld [vmem:[%s6564_s5 + $0x4c0] ss:$16 sps:$4 sm:$0xff]   ;;  %v5873_v41 = vld [vmem:[%s6564_s5 + $0x4c8] ss:$16 sps:$4 sm:$0xff]  }
 0x4c3   : > { %4085 = vmatpush1.bf16.msra.mxu0 %v5780_v50  ;;  %4214 = vmatpush1.bf16.msra.mxu1 %v5783_v54  ;;  %v5878_v50 = vld [vmem:[%s6564_s5 + $0x4e4] ss:$16 sps:$4 sm:$0xff]   ;;  %v5881_v54 = vld [vmem:[%s6564_s5 + $0x4ec] ss:$16 sps:$4 sm:$0xff]  }
 0x4c4   : > { %4086 = vmatprep.subr.bf16.mxu0 %v5788_v62  ;;  %4215 = vmatprep.subr.bf16.mxu1 %v5791_v56  ;;  %v5876_v62 = vld [vmem:[%s6564_s5 + $0x4e0] ss:$16 sps:$4 sm:$0xff]   ;;  %v5879_v56 = vld [vmem:[%s6564_s5 + $0x4e8] ss:$16 sps:$4 sm:$0xff]  }
 0x4c7   : > { %4087 = vmatpush1.bf16.msra.mxu0 %v5786_v55  ;;  %4216 = vmatpush1.bf16.msra.mxu1 %v5789_v63  ;;  %v5884_v55 = vld [vmem:[%s6564_s5 + $0x504] ss:$16 sps:$4 sm:$0xff]   ;;  %v5887_v63 = vld [vmem:[%s6564_s5 + $0x50c] ss:$16 sps:$4 sm:$0xff]  }
 0x4c8   : > { %4088 = vmatprep.subr.bf16.mxu0 %v5794_v4  ;;  %4217 = vmatprep.subr.bf16.mxu1 %v5797_v13  ;;  %v5882_v4 = vld [vmem:[%s6564_s5 + $0x500] ss:$16 sps:$4 sm:$0xff]   ;;  %v5885_v13 = vld [vmem:[%s6564_s5 + $0x508] ss:$16 sps:$4 sm:$0xff]  }
 0x4cb   : > { %4089 = vmatpush1.bf16.msra.mxu0 %v5792_v8  ;;  %4218 = vmatpush1.bf16.msra.mxu1 %v5795_v15  ;;  %v5890_v8 = vld [vmem:[%s6564_s5 + $0x524] ss:$16 sps:$4 sm:$0xff]   ;;  %v5893_v15 = vld [vmem:[%s6564_s5 + $0x52c] ss:$16 sps:$4 sm:$0xff]  }
 0x4cc   : > { %4090 = vmatprep.subr.bf16.mxu0 %v5800_v9  ;;  %4219 = vmatprep.subr.bf16.mxu1 %v5803_v11  ;;  %v5888_v9 = vld [vmem:[%s6564_s5 + $0x520] ss:$16 sps:$4 sm:$0xff]   ;;  %v5891_v11 = vld [vmem:[%s6564_s5 + $0x528] ss:$16 sps:$4 sm:$0xff]  }
 0x4cf   : > { %4091 = vmatpush1.bf16.msra.mxu0 %v5798_v2  ;;  %4220 = vmatpush1.bf16.msra.mxu1 %v5801_v6  ;;  %v5896_v2 = vld [vmem:[%s6564_s5 + $0x544] ss:$16 sps:$4 sm:$0xff]   ;;  %v5899_v6 = vld [vmem:[%s6564_s5 + $0x54c] ss:$16 sps:$4 sm:$0xff]  }
 0x4d0   : > { %4092 = vmatprep.subr.bf16.mxu0 %v5806_v12  ;;  %4221 = vmatprep.subr.bf16.mxu1 %v5809_v27  ;;  %v5894_v12 = vld [vmem:[%s6564_s5 + $0x540] ss:$16 sps:$4 sm:$0xff]   ;;  %v5897_v27 = vld [vmem:[%s6564_s5 + $0x548] ss:$16 sps:$4 sm:$0xff]  }
 0x4d3   : > { %4093 = vmatpush1.bf16.msra.mxu0 %v5804_v14  ;;  %4222 = vmatpush1.bf16.msra.mxu1 %v5807_v18  ;;  %v5902_v14 = vld [vmem:[%s6564_s5 + $0x564] ss:$16 sps:$4 sm:$0xff]   ;;  %v5905_v18 = vld [vmem:[%s6564_s5 + $0x56c] ss:$16 sps:$4 sm:$0xff]  }
 0x4d4   : > { %4094 = vmatprep.subr.bf16.mxu0 %v5812_v19  ;;  %4223 = vmatprep.subr.bf16.mxu1 %v5815_v20  ;;  %v5900_v19 = vld [vmem:[%s6564_s5 + $0x560] ss:$16 sps:$4 sm:$0xff]   ;;  %v5903_v20 = vld [vmem:[%s6564_s5 + $0x568] ss:$16 sps:$4 sm:$0xff]  }
 0x4d7   : > { %4095 = vmatpush1.bf16.msra.mxu0 %v5810_v3  ;;  %4224 = vmatpush1.bf16.msra.mxu1 %v5813_v58  ;;  %v5908_v3 = vld [vmem:[%s6564_s5 + $0x584] ss:$16 sps:$4 sm:$0xff]   ;;  %v5911_v58 = vld [vmem:[%s6564_s5 + $0x58c] ss:$16 sps:$4 sm:$0xff]  }
 0x4d8   : > { %4096 = vmatprep.subr.bf16.mxu0 %v5818_v5  ;;  %4225 = vmatprep.subr.bf16.mxu1 %v5821_v60  ;;  %v5906_v5 = vld [vmem:[%s6564_s5 + $0x580] ss:$16 sps:$4 sm:$0xff]   ;;  %v5909_v60 = vld [vmem:[%s6564_s5 + $0x588] ss:$16 sps:$4 sm:$0xff]  }
 0x4db   : > { %4097 = vmatpush1.bf16.msra.mxu0 %v5816_v22  ;;  %4226 = vmatpush1.bf16.msra.mxu1 %v5819_v61  ;;  %v5914_v22 = vld [vmem:[%s6564_s5 + $0x5a4] ss:$16 sps:$4 sm:$0xff]   ;;  %v5917_v61 = vld [vmem:[%s6564_s5 + $0x5ac] ss:$16 sps:$4 sm:$0xff]  }
 0x4dc   : > { %4098 = vmatprep.subr.bf16.mxu0 %v5824_v59  ;;  %4227 = vmatprep.subr.bf16.mxu1 %v5827_v10  ;;  %v5912_v59 = vld [vmem:[%s6564_s5 + $0x5a0] ss:$16 sps:$4 sm:$0xff]   ;;  %v5915_v10 = vld [vmem:[%s6564_s5 + $0x5a8] ss:$16 sps:$4 sm:$0xff]  }
 0x4df   : > { %4099 = vmatpush1.bf16.msra.mxu0 %v5822_v16  ;;  %4228 = vmatpush1.bf16.msra.mxu1 %v5825_v23  ;;  %v5920_v16 = vld [vmem:[%s6564_s5 + $0x5c4] ss:$16 sps:$4 sm:$0xff]   ;;  %v5923_v23 = vld [vmem:[%s6564_s5 + $0x5cc] ss:$16 sps:$4 sm:$0xff]  }
 0x4e0   : > { %4100 = vmatprep.subr.bf16.mxu0 %v5830_v17  ;;  %4229 = vmatprep.subr.bf16.mxu1 %v5833_v25  ;;  %v5918_v17 = vld [vmem:[%s6564_s5 + $0x5c0] ss:$16 sps:$4 sm:$0xff]   ;;  %v5921_v25 = vld [vmem:[%s6564_s5 + $0x5c8] ss:$16 sps:$4 sm:$0xff]  }
 0x4e3   : > { %4101 = vmatpush1.bf16.msra.mxu0 %v5828_v7  ;;  %4230 = vmatpush1.bf16.msra.mxu1 %v5831_v28  ;;  %v5926_v7 = vld [vmem:[%s6564_s5 + $0x5e4] ss:$16 sps:$4 sm:$0xff]   ;;  %v5929_v28 = vld [vmem:[%s6564_s5 + $0x5ec] ss:$16 sps:$4 sm:$0xff]  }
 0x4e4   : > { %4113 = vmatprep.subr.bf16.mxu0 %v5836_v49  ;;  %4242 = vmatprep.subr.bf16.mxu1 %v5839_v34  ;;  %v5924_v49 = vld [vmem:[%s6564_s5 + $0x5e0] ss:$16 sps:$4 sm:$0xff]   ;;  %v5927_v34 = vld [vmem:[%s6564_s5 + $0x5e8] ss:$16 sps:$4 sm:$0xff]  }
 0x4e6   : > { %4103 = vmatmul.mubr.bf16.vlgmr.msra.gmra.mrb[0].mxu0 %v2849_v21  ;;  %4232 = vmatmul.mubr.bf16.vlgmr.msra.gmra.mrb[0].mxu1 %v2849_v21 }
 0x4e7   : > { %4114 = vmatpush1.bf16.msra.mxu0 %v5834_v48  ;;  %4243 = vmatpush1.bf16.msra.mxu1 %v5837_v29  ;;  %v2851_v48 = vld [vmem:[#allocation2 + $0x20] sm:$0xff]  ;;  %v3047_v29 = vlaneseq }
 0x4e8   : > { %4115 = vmatprep.subr.bf16.mxu0 %v5842_v30  ;;  %4244 = vmatprep.subr.bf16.mxu1 %v5845_v24 }
 0x4e9   : > { %4145 = vmatprep.mubr.bf16.mxu0 %v2852_v31  ;;  %4274 = vmatprep.mubr.bf16.mxu1 %v2852_v31  ;;  %v3048_v21 = vshrl.u32 %v3047_v29, 7  ;;  %v3045_v31 = vld [vmem:[%s6572_s22] sm:$0xf] }
 0x4eb   : > { %4116 = vmatpush1.bf16.msra.mxu0 %v5840_v33  ;;  %4245 = vmatpush1.bf16.msra.mxu1 %v5843_v35  ;;  %v3049_v30 = vsub.s32 0, %v3048_v21  ;;  %v3057_v24 = vsub.s32 2, %v3048_v21  ;;  %v3053_v33 = vsub.s32 1, %v3048_v21  ;;  %v3061_v35 = vsub.s32 3, %v3048_v21 }
 0x4ec   : > { %4117 = vmatprep.subr.bf16.mxu0 %v5848_v37  ;;  %4246 = vmatprep.subr.bf16.mxu1 %v5851_v26 }
 0x4ed   : > { %v3050_v37 = vrot.slane %v3045_v31, %v3049_v30  ;;  %v3058_v26 = vrot.slane %v3045_v31, %v3057_v24 }
 0x4ef   : > { %4118 = vmatpush1.bf16.msra.mxu0 %v5846_v38  ;;  %4247 = vmatpush1.bf16.msra.mxu1 %v5849_v39  ;;  %v3054_v38 = vrot.slane %v3045_v31, %v3053_v33  ;;  %v3062_v39 = vrot.slane %v3045_v31, %v3061_v35 }
 0x4f0   : > { %4119 = vmatprep.subr.bf16.mxu0 %v5854_v40  ;;  %4248 = vmatprep.subr.bf16.mxu1 %v5857_v42 }
 0x4f3   : > { %4120 = vmatpush1.bf16.msra.mxu0 %v5852_v32  ;;  %4249 = vmatpush1.bf16.msra.mxu1 %v5855_v43 }
 0x4f4   : > { %4121 = vmatprep.subr.bf16.mxu0 %v5860_v36  ;;  %4250 = vmatprep.subr.bf16.mxu1 %v5863_v47 }
 0x4f7   : > { %4122 = vmatpush1.bf16.msra.mxu0 %v5858_v51  ;;  %4251 = vmatpush1.bf16.msra.mxu1 %v5861_v52 }
 0x4f8   : > { %4123 = vmatprep.subr.bf16.mxu0 %v5866_v53  ;;  %4252 = vmatprep.subr.bf16.mxu1 %v5869_v46 }
 0x4fb   : > { %4124 = vmatpush1.bf16.msra.mxu0 %v5864_v57  ;;  %4253 = vmatpush1.bf16.msra.mxu1 %v5867_v0 }
 0x4fc   : > { %4125 = vmatprep.subr.bf16.mxu0 %v5872_v1  ;;  %4254 = vmatprep.subr.bf16.mxu1 %v5875_v44 }
 0x4ff   : > { %4126 = vmatpush1.bf16.msra.mxu0 %v5870_v45  ;;  %4255 = vmatpush1.bf16.msra.mxu1 %v5873_v41 }
 0x500   : > { %4127 = vmatprep.subr.bf16.mxu0 %v5878_v50  ;;  %4256 = vmatprep.subr.bf16.mxu1 %v5881_v54 }
 0x503   : > { %4128 = vmatpush1.bf16.msra.mxu0 %v5876_v62  ;;  %4257 = vmatpush1.bf16.msra.mxu1 %v5879_v56 }
 0x504   : > { %4129 = vmatprep.subr.bf16.mxu0 %v5884_v55  ;;  %4258 = vmatprep.subr.bf16.mxu1 %v5887_v63 }
 0x507   : > { %4130 = vmatpush1.bf16.msra.mxu0 %v5882_v4  ;;  %4259 = vmatpush1.bf16.msra.mxu1 %v5885_v13 }
 0x508   : > { %4131 = vmatprep.subr.bf16.mxu0 %v5890_v8  ;;  %4260 = vmatprep.subr.bf16.mxu1 %v5893_v15 }
 0x50b   : > { %4132 = vmatpush1.bf16.msra.mxu0 %v5888_v9  ;;  %4261 = vmatpush1.bf16.msra.mxu1 %v5891_v11 }
 0x50c   : > { %4133 = vmatprep.subr.bf16.mxu0 %v5896_v2  ;;  %4262 = vmatprep.subr.bf16.mxu1 %v5899_v6 }
 0x50f   : > { %4134 = vmatpush1.bf16.msra.mxu0 %v5894_v12  ;;  %4263 = vmatpush1.bf16.msra.mxu1 %v5897_v27 }
 0x510   : > { %4135 = vmatprep.subr.bf16.mxu0 %v5902_v14  ;;  %4264 = vmatprep.subr.bf16.mxu1 %v5905_v18 }
 0x513   : > { %4136 = vmatpush1.bf16.msra.mxu0 %v5900_v19  ;;  %4265 = vmatpush1.bf16.msra.mxu1 %v5903_v20 }
 0x514   : > { %4137 = vmatprep.subr.bf16.mxu0 %v5908_v3  ;;  %4266 = vmatprep.subr.bf16.mxu1 %v5911_v58 }
 0x517   : > { %4138 = vmatpush1.bf16.msra.mxu0 %v5906_v5  ;;  %4267 = vmatpush1.bf16.msra.mxu1 %v5909_v60 }
 0x518   : > { %4139 = vmatprep.subr.bf16.mxu0 %v5914_v22  ;;  %4268 = vmatprep.subr.bf16.mxu1 %v5917_v61 }
 0x51b   : > { %4140 = vmatpush1.bf16.msra.mxu0 %v5912_v59  ;;  %4269 = vmatpush1.bf16.msra.mxu1 %v5915_v10 }
 0x51c   : > { %4141 = vmatprep.subr.bf16.mxu0 %v5920_v16  ;;  %4270 = vmatprep.subr.bf16.mxu1 %v5923_v23 }
 0x51f   : > { %4142 = vmatpush1.bf16.msra.mxu0 %v5918_v17  ;;  %4271 = vmatpush1.bf16.msra.mxu1 %v5921_v25 }
 0x520   : > { %4143 = vmatprep.subr.bf16.mxu0 %v5926_v7  ;;  %4272 = vmatprep.subr.bf16.mxu1 %v5929_v28 }
 0x523   : > { %4144 = vmatpush1.bf16.msra.mxu0 %v5924_v49  ;;  %4273 = vmatpush1.bf16.msra.mxu1 %v5927_v34 }
 0x526   : > { %4146 = vmatmul.mubr.bf16.vlgmr.msra.gmra.mrb[0].mxu0 %v2851_v48  ;;  %4275 = vmatmul.mubr.bf16.vlgmr.msra.gmra.mrb[0].mxu1 %v2851_v48 }
 0x5f9   : > { %v4147_v40 = vpop.f32.mrb[0].mxu0  ;;  %v4276_v42 = vpop.f32.mrb[0].mxu1 }
 0x5fa   : > { %v5019_v32 = vadd.f32 %v4147_v40, %v3050_v37  ;;  %v5023_v43 = vadd.f32 %v4276_v42, %v3058_v26  ;;  %v4149_v36 = vpop.f32.mrb[1].mxu0  ;;  %v4278_v47 = vpop.f32.mrb[1].mxu1 }
 0x5fb   : > { %v5020_v51 = vadd.f32 %v4149_v36, %v3054_v38  ;;  %v5024_v52 = vadd.f32 %v4278_v47, %v3062_v39  ;;  %v4151_v53 = vpop.f32.mrb[2].mxu0  ;;  %v4280_v46 = vpop.f32.mrb[2].mxu1 }
 0x5fc   : > { %4285 = vst [vmem:[%s6574_s1] sm:$0xff] %v5019_v32  ;;  %4287 = vst [vmem:[%s6574_s1 + $0x10] sm:$0xff] %v5023_v43  ;;  %v5021_v57 = vadd.f32 %v4151_v53, %v3050_v37  ;;  %v5025_v0 = vadd.f32 %v4280_v46, %v3058_v26  ;;  %v4153_v1 = vpop.f32.mrb[3].mxu0  ;;  %v4282_v44 = vpop.f32.mrb[3].mxu1 }
 0x5fd   : > { %4286 = vst [vmem:[%s6574_s1 + $0x8] sm:$0xff] %v5020_v51  ;;  %4288 = vst [vmem:[%s6574_s1 + $0x18] sm:$0xff] %v5024_v52  ;;  %v5022_v45 = vadd.f32 %v4153_v1, %v3054_v38  ;;  %v5026_v41 = vadd.f32 %v4282_v44, %v3062_v39 }
 0x5fe   : > { %4289 = vst [vmem:[%s6574_s1 + $0x20] sm:$0xff] %v5021_v57  ;;  %4291 = vst [vmem:[%s6574_s1 + $0x30] sm:$0xff] %v5025_v0 }
 0x5ff   : > { %4290 = vst [vmem:[%s6574_s1 + $0x28] sm:$0xff] %v5022_v45  ;;  %4292 = vst [vmem:[%s6574_s1 + $0x38] sm:$0xff] %v5026_v41 }
 0x600   : > { %6143 = shalt.err (!%p6140_p0)
}
 0x601   : > { %s6144_s15 = scalar_lea.hbm %s6852_s27, 1024  ;;  %s6148_s11 = scalar_lea.hbm %s6918_s7, 2048 }
 0x602   : > { %p6145_p5 = scmp.ne.s32.totalorder %s6852_s27, %s6144_s15  ;;  %p6149_p7 = scmp.lt.u32.totalorder %s6852_s27, %s6918_s7 }
 0x603   : > { %p6150_p4 = scmp.lt.u32.totalorder %s6148_s11, %s6144_s15  ;;  %p6152_p13 = scmp.lt.u32.totalorder %s6144_s15, %s6852_s27 }
 0x604   : > { %p6146_p10 = pnand %p6145_p5, %p6974_p3 }
 0x605   : > { %p6151_p6 = por %p6150_p4, %p6149_p7 }
 0x606   : > { %p6147_p2 = pneg %p6146_p10 }
 0x607   : > { %p6153_p12 = por %p6152_p13, %p6151_p6 }
 0x609   : > { %p6154_p8 = pnand %p6153_p12, %p6147_p2 }
 0x60b   : > { %6157 = shalt.err (!%p6154_p8)
}
 0x60c   : > { %s6239_s5 = smov 512   ;;  %s6240_s19 = smov 1024  }
 0x60d   : > { %s6241_s20 = smov 32  }
 0x60e   : > { %5069 = dma.vmem_to_hbm [thread:$0]  (%p6974_p3), %s6856_s9, 1024, %s6852_s27, %s4294_s13, %s6239_s5, %s6240_s19, %s6241_s20  }
 0x60f PF: > { %s6975_s22 = sld [smem:[#allocation21_spill]]  ;;  %s6976_s1 = sld [smem:[#allocation23_spill]] }
 0x610   : > { %s6977_s30 = sld [smem:[#allocation22_spill]] }
 0x615   : > { %s4325_s8 = sand.u32 1, %s6975_s22   ;;  %p6978_p11 = scmp.ne.s32.totalorder %s6976_s1, 0 }
 0x616   : > { %p6979_p1 = scmp.ge.s32.totalorder %s6977_s30, 2  ;;  %s4326_s14 = scalar_lea.sflag [#allocation5], %s4325_s8 }
 0x618   : > { %p5095_p9 = pnand %p6979_p1, %p6978_p11 }
 0x61a   : > { %6199 = dma.done.wait (!%p5095_p9), %s4326_s14, 1024  }
 0x61b   : > { %6201 = vsyncadd (!%p5095_p9), %s4326_s14, 4294966272  ;;  %s26_s29 = sadd.s32 1, %s6977_s30   ;;  %s6980_s23 = sld [smem:[#allocation26_spill]] }
 0x61c   : > { %p23_p0 = scmp.ge.s32.totalorder %s26_s29, 4   ;;  %s6981_s17 = sld [smem:[#allocation24_spill]] }
 0x61d   : > { %s6982_s24 = smov %s6208_s25  ;;  %s6983_s25 = smov %s6212_s26 }
 0x61e   : > { %s6985_s27 = smov %s6220_s28  ;;  %25 = sbr.rel (!%p23_p0) target bundleno = 13 (0xd), region = 130 }
 0x621   : > { %s6984_s26 = smov %s6980_s23 }
 0x622   : > { %s6986_s28 = smov %s6981_s17 }
 0x625   :  { %4331 = vsyncpa [#allocation4], 1 }
 0x626   :  { %4333 = vsyncpa [#allocation4 + $0x1], 1 }
 0x627   :  { %4334 = vsyncpa [#allocation7], 1 }
 0x628   :  { %4335 = vsyncpa [#allocation10], 1 }
 0x629   :  { %4336 = vsyncpa [#allocation13], 1 }
 0x62a   :  { %4338 = vsyncpa [#allocation13 + $0x1], 1 }
 0x62b   :  { %4339 = vsyncpa [#allocation5], 1 }
 0x62c   :  { %4341 = vsyncpa [#allocation5 + $0x1], 1 }

</bundles_post_ra>
